<compile_context>
chip_gen: v5e
topology: v5e:2x2
jax: 0.10.0
libtpu: 0.0.40
codegen_flags: <defaults>
</compile_context>

<pallas_src>
import functools

import jax
import jax.numpy as jnp
from jax.experimental import pallas as pl
from jax.experimental.pallas import tpu as pltpu


def _sigmoid(v):
    # Numerically stable, single-EUP-op sigmoid (no divide on the serial path).
    return 0.5 * (jnp.tanh(0.5 * v) + 1.0)


def _lstm_kernel(num_layers, hidden_size, *refs):
    # refs = [x, h0, c0, Wx*L, Wh*L, b*L, W_hy, b_y,
    #         y_out, h_seq_out, c_seq_out, h_final_out, c_final_out]
    L, H = num_layers, hidden_size
    x_ref, h0_ref, c0_ref = refs[0], refs[1], refs[2]
    wx_refs = refs[3:3 + L]
    wh_refs = refs[3 + L:3 + 2 * L]
    b_refs = refs[3 + 2 * L:3 + 3 * L]
    why_ref, by_ref = refs[3 + 3 * L], refs[4 + 3 * L]
    y_ref, hs_ref, cs_ref, hf_ref, cf_ref = refs[5 + 3 * L:]

    B, S, I = x_ref.shape

    # ---- Loop-invariant loads (hoisted out of the fully-unrolled time loop). ----
    wx = [wx_refs[l][...] for l in range(L)]          # (I_l, 4H)
    wh = [wh_refs[l][...] for l in range(L)]          # (H, 4H)
    bias = [b_refs[l][...] for l in range(L)]         # (1, 4H)
    w_hy = why_ref[...]                               # (H, O)
    b_y = by_ref[...]                                 # (1, O)

    # ---- Prologue: hoisted layer-0 input projection (+ bias) for ALL timesteps. ----
    x_flat = x_ref[...].reshape(B * S, I)             # rows ordered (b, t)
    xw0 = (jnp.dot(x_flat, wx[0], preferred_element_type=jnp.float32)
           + bias[0]).reshape(B, S, 4 * H)
    xw0_t = [xw0[:, t, :] for t in range(S)]          # (B, 4H) per step; off the critical path

    # Running per-layer states kept as values (stay in vregs across the unrolled loop).
    h = [h0_ref[l] for l in range(L)]
    c = [c0_ref[l] for l in range(L)]
    h_top = []                                        # last-layer hidden state per timestep

    # ---- Time recurrence: fully unrolled (S, L are small compile-time constants). ----
    for t in range(S):
        for l in range(L):
            if l == 0:
                z = xw0_t[t] + jnp.dot(h[0], wh[0], preferred_element_type=jnp.float32)
            else:
                z = (jnp.dot(h[l - 1], wx[l], preferred_element_type=jnp.float32)
                     + jnp.dot(h[l], wh[l], preferred_element_type=jnp.float32)
                     + bias[l])
            # Fused activations: one full-vreg sigmoid pass + one narrow tanh.
            sig = _sigmoid(z)                          # (B, 4H)
            g_t = jnp.tanh(z[:, 3 * H:4 * H])
            i_t = sig[:, 0 * H:1 * H]
            f_t = sig[:, 1 * H:2 * H]
            o_t = sig[:, 2 * H:3 * H]
            c[l] = f_t * c[l] + i_t * g_t
            h[l] = o_t * jnp.tanh(c[l])
            hs_ref[l, t] = h[l]                        # snapshot, already in final layout
            cs_ref[l, t] = c[l]
        h_top.append(h[L - 1])

    # ---- Final states: written once, after the loop. ----
    hf_ref[...] = jnp.stack(h, axis=0)
    cf_ref[...] = jnp.stack(c, axis=0)

    # ---- Hoisted output projection: one matmul for all timesteps, final layout. ----
    h_stack = jnp.stack(h_top, axis=1).reshape(B * S, H)   # rows ordered (b, t)
    y = jnp.dot(h_stack, w_hy, preferred_element_type=jnp.float32) + b_y
    y_ref[...] = y.reshape(B, S, -1).astype(y_ref.dtype)


def fuse_params(layers, W_hy, b_y):
    """One-time (init-path) fusion of per-gate weights into (.., 4H) slabs.

    Gate order along the fused axis: [i, f, o, c(g)]."""
    H = W_hy.shape[0]
    wx, wh, bs = [], [], []
    for p in layers:
        wx.append(jnp.concatenate([p["W_xi"], p["W_xf"], p["W_xo"], p["W_xc"]], axis=1))  # (I_l, 4H)
        wh.append(jnp.concatenate([p["W_hi"], p["W_hf"], p["W_ho"], p["W_hc"]], axis=1))  # (H, 4H)
        bs.append(jnp.concatenate([p["b_i"], p["b_f"], p["b_o"], p["b_c"]]).reshape(1, 4 * H))
    return {
        "wx": wx, "wh": wh, "b": bs,
        "W_hy": W_hy, "b_y": b_y.reshape(1, -1),
        "num_layers": len(layers), "hidden_size": H,
    }


def tiny_lstm_forward(x, fused, states=None):
    """x: (B, S, I) f32; `fused` from fuse_params. Returns, like the PyTorch module:
    (outputs (B,S,O), (h_seq (L,S,B,H), c_seq (L,S,B,H)), (h_cur (L,B,H), c_cur (L,B,H)))."""
    B, S, _ = x.shape
    L, H = fused["num_layers"], fused["hidden_size"]
    O = fused["W_hy"].shape[1]

    if states is None:
        h0 = jnp.zeros((L, B, H), jnp.float32)
        c0 = jnp.zeros((L, B, H), jnp.float32)
    else:
        h0, c0 = states

    in_arrays = ([x, h0, c0] + list(fused["wx"]) + list(fused["wh"]) + list(fused["b"])
                 + [fused["W_hy"], fused["b_y"]])

    out_shape = (
        jax.ShapeDtypeStruct((B, S, O), jnp.float32),     # y        (final layout)
        jax.ShapeDtypeStruct((L, S, B, H), jnp.float32),  # h_seq    (final layout)
        jax.ShapeDtypeStruct((L, S, B, H), jnp.float32),  # c_seq    (final layout)
        jax.ShapeDtypeStruct((L, B, H), jnp.float32),     # h_final
        jax.ShapeDtypeStruct((L, B, H), jnp.float32),     # c_final
    )
    vmem = lambda: pl.BlockSpec(memory_space=pltpu.MemorySpace.VMEM)

    y, h_seq, c_seq, h_fin, c_fin = pl.pallas_call(
        functools.partial(_lstm_kernel, L, H),
        out_shape=out_shape,
        in_specs=[vmem() for _ in in_arrays],
        out_specs=tuple(vmem() for _ in out_shape),
    )(*in_arrays)

    return y, (h_seq, c_seq), (h_fin, c_fin)


def _reference(x, layers, W_hy, b_y):
    """Pure-JAX mirror of the PyTorch TinyLSTM.forward (per-gate weights)."""
    B, S, _ = x.shape
    L = len(layers)
    H = W_hy.shape[0]
    h = jnp.zeros((L, B, H), jnp.float32)
    c = jnp.zeros((L, B, H), jnp.float32)
    outs, hss, css = [], [], []
    for t in range(S):
        inp = x[:, t, :]
        for l, p in enumerate(layers):
            i_t = jax.nn.sigmoid(inp @ p["W_xi"] + h[l] @ p["W_hi"] + p["b_i"])
            f_t = jax.nn.sigmoid(inp @ p["W_xf"] + h[l] @ p["W_hf"] + p["b_f"])
            o_t = jax.nn.sigmoid(inp @ p["W_xo"] + h[l] @ p["W_ho"] + p["b_o"])
            g_t = jnp.tanh(inp @ p["W_xc"] + h[l] @ p["W_hc"] + p["b_c"])
            c = c.at[l].set(f_t * c[l] + i_t * g_t)
            h = h.at[l].set(o_t * jnp.tanh(c[l]))
            inp = h[l]
        outs.append(inp @ W_hy + b_y)
        hss.append(h)
        css.append(c)
    return (jnp.stack(outs, axis=1),
            (jnp.stack(hss, axis=1), jnp.stack(css, axis=1)),
            (h, c))


def _init_params(key, input_size, hidden_size, output_size, num_layers):
    keys = iter(jax.random.split(key, num_layers * 8 + 1))
    layers = []
    for l in range(num_layers):
        in_dim = input_size if l == 0 else hidden_size
        p = {}
        for gate in ("i", "f", "o", "c"):
            p[f"W_x{gate}"] = jax.random.normal(next(keys), (in_dim, hidden_size), jnp.float32) * 0.01
            p[f"W_h{gate}"] = jax.random.normal(next(keys), (hidden_size, hidden_size), jnp.float32) * 0.01
            p[f"b_{gate}"] = jnp.zeros((hidden_size,), jnp.float32)
        layers.append(p)
    W_hy = jax.random.normal(next(keys), (hidden_size, output_size), jnp.float32) * 0.01
    b_y = jnp.zeros((output_size,), jnp.float32)
    return layers, W_hy, b_y


if __name__ == "__main__":
    B, S, I, H, O, L = 2, 8, 16, 32, 8, 2

    root = jax.random.PRNGKey(0)
    k_params, k_x = jax.random.split(root)
    layers, W_hy, b_y = _init_params(k_params, I, H, O, L)
    x = jax.random.normal(k_x, (B, S, I), jnp.float32)

    # Weight fusion happens once, at init (off the per-call path).
    fused = fuse_params(layers, W_hy, b_y)

    outputs, (h_seq, c_seq), (h_cur, c_cur) = jax.block_until_ready(
        tiny_lstm_forward(x, fused)
    )

    ref_out, (ref_hs, ref_cs), (ref_h, ref_c) = _reference(x, layers, W_hy, b_y)

    assert outputs.shape == (B, S, O)
    assert h_seq.shape == (L, S, B, H) and c_seq.shape == (L, S, B, H)
    assert h_cur.shape == (L, B, H) and c_cur.shape == (L, B, H)
    for got, want in [(outputs, ref_out), (h_seq, ref_hs), (c_seq, ref_cs),
                      (h_cur, ref_h), (c_cur, ref_c)]:
        assert jnp.allclose(got, want, atol=1e-4, rtol=1e-4)

    print("KERNEL_OK")
</pallas_src>

<mosaic_0001>
module attributes {stable_mosaic.version = 11 : i64} {
  func.func @_lstm_kernel(%arg0: memref<2x8x16xf32, #tpu.memory_space<vmem>>, %arg1: memref<2x2x32xf32, #tpu.memory_space<vmem>>, %arg2: memref<2x2x32xf32, #tpu.memory_space<vmem>>, %arg3: memref<16x128xf32, #tpu.memory_space<vmem>>, %arg4: memref<32x128xf32, #tpu.memory_space<vmem>>, %arg5: memref<32x128xf32, #tpu.memory_space<vmem>>, %arg6: memref<32x128xf32, #tpu.memory_space<vmem>>, %arg7: memref<1x128xf32, #tpu.memory_space<vmem>>, %arg8: memref<1x128xf32, #tpu.memory_space<vmem>>, %arg9: memref<32x8xf32, #tpu.memory_space<vmem>>, %arg10: memref<1x8xf32, #tpu.memory_space<vmem>>, %arg11: memref<2x8x8xf32, #tpu.memory_space<vmem>>, %arg12: memref<2x8x2x32xf32, #tpu.memory_space<vmem>>, %arg13: memref<2x8x2x32xf32, #tpu.memory_space<vmem>>, %arg14: memref<2x2x32xf32, #tpu.memory_space<vmem>>, %arg15: memref<2x2x32xf32, #tpu.memory_space<vmem>>) attributes {dimension_semantics = [], scalar_prefetch = 0 : i64, scratch_operands = 0 : i64, tpu.core_type = #tpu.core_type<tc>} {
    %c0 = arith.constant 0 : index
    %c0_0 = arith.constant 0 : index
    %0 = vector.load %arg3[%c0, %c0_0] : memref<16x128xf32, #tpu.memory_space<vmem>>, vector<16x128xf32>
    %c0_1 = arith.constant 0 : index
    %c0_2 = arith.constant 0 : index
    %1 = vector.load %arg4[%c0_1, %c0_2] : memref<32x128xf32, #tpu.memory_space<vmem>>, vector<32x128xf32>
    %c0_3 = arith.constant 0 : index
    %c0_4 = arith.constant 0 : index
    %2 = vector.load %arg5[%c0_3, %c0_4] : memref<32x128xf32, #tpu.memory_space<vmem>>, vector<32x128xf32>
    %c0_5 = arith.constant 0 : index
    %c0_6 = arith.constant 0 : index
    %3 = vector.load %arg6[%c0_5, %c0_6] : memref<32x128xf32, #tpu.memory_space<vmem>>, vector<32x128xf32>
    %c0_7 = arith.constant 0 : index
    %c0_8 = arith.constant 0 : index
    %4 = vector.load %arg7[%c0_7, %c0_8] : memref<1x128xf32, #tpu.memory_space<vmem>>, vector<1x128xf32>
    %c0_9 = arith.constant 0 : index
    %c0_10 = arith.constant 0 : index
    %5 = vector.load %arg8[%c0_9, %c0_10] : memref<1x128xf32, #tpu.memory_space<vmem>>, vector<1x128xf32>
    %c0_11 = arith.constant 0 : index
    %c0_12 = arith.constant 0 : index
    %6 = vector.load %arg9[%c0_11, %c0_12] : memref<32x8xf32, #tpu.memory_space<vmem>>, vector<32x8xf32>
    %c0_13 = arith.constant 0 : index
    %c0_14 = arith.constant 0 : index
    %7 = vector.load %arg10[%c0_13, %c0_14] : memref<1x8xf32, #tpu.memory_space<vmem>>, vector<1x8xf32>
    %c0_15 = arith.constant 0 : index
    %c0_16 = arith.constant 0 : index
    %c0_17 = arith.constant 0 : index
    %8 = vector.load %arg0[%c0_15, %c0_16, %c0_17] : memref<2x8x16xf32, #tpu.memory_space<vmem>>, vector<2x8x16xf32>
    %9 = vector.shape_cast %8 : vector<2x8x16xf32> to vector<16x16xf32>
    %cst = arith.constant dense<0.000000e+00> : vector<16x128xf32>
    %10 = tpu.matmul %9, %0, %cst {dimension_numbers = #tpu.dot_dimension_numbers<[1], [0], [0], [1], [0, 0, 1, 1], [], []>} : vector<16x16xf32>, vector<16x128xf32>, vector<16x128xf32> -> vector<16x128xf32>
    %11 = vector.broadcast %4 : vector<1x128xf32> to vector<16x128xf32>
    %12 = arith.addf %10, %11 : vector<16x128xf32>
    %13 = vector.shape_cast %12 : vector<16x128xf32> to vector<2x8x128xf32>
    %14 = vector.extract_strided_slice %13 {offsets = [0, 0, 0], sizes = [2, 1, 128], strides = [1, 1, 1]} : vector<2x8x128xf32> to vector<2x1x128xf32>
    %15 = vector.shape_cast %14 : vector<2x1x128xf32> to vector<2x128xf32>
    %16 = vector.extract_strided_slice %13 {offsets = [0, 1, 0], sizes = [2, 1, 128], strides = [1, 1, 1]} : vector<2x8x128xf32> to vector<2x1x128xf32>
    %17 = vector.shape_cast %16 : vector<2x1x128xf32> to vector<2x128xf32>
    %18 = vector.extract_strided_slice %13 {offsets = [0, 2, 0], sizes = [2, 1, 128], strides = [1, 1, 1]} : vector<2x8x128xf32> to vector<2x1x128xf32>
    %19 = vector.shape_cast %18 : vector<2x1x128xf32> to vector<2x128xf32>
    %20 = vector.extract_strided_slice %13 {offsets = [0, 3, 0], sizes = [2, 1, 128], strides = [1, 1, 1]} : vector<2x8x128xf32> to vector<2x1x128xf32>
    %21 = vector.shape_cast %20 : vector<2x1x128xf32> to vector<2x128xf32>
    %22 = vector.extract_strided_slice %13 {offsets = [0, 4, 0], sizes = [2, 1, 128], strides = [1, 1, 1]} : vector<2x8x128xf32> to vector<2x1x128xf32>
    %23 = vector.shape_cast %22 : vector<2x1x128xf32> to vector<2x128xf32>
    %24 = vector.extract_strided_slice %13 {offsets = [0, 5, 0], sizes = [2, 1, 128], strides = [1, 1, 1]} : vector<2x8x128xf32> to vector<2x1x128xf32>
    %25 = vector.shape_cast %24 : vector<2x1x128xf32> to vector<2x128xf32>
    %26 = vector.extract_strided_slice %13 {offsets = [0, 6, 0], sizes = [2, 1, 128], strides = [1, 1, 1]} : vector<2x8x128xf32> to vector<2x1x128xf32>
    %27 = vector.shape_cast %26 : vector<2x1x128xf32> to vector<2x128xf32>
    %28 = vector.extract_strided_slice %13 {offsets = [0, 7, 0], sizes = [2, 1, 128], strides = [1, 1, 1]} : vector<2x8x128xf32> to vector<2x1x128xf32>
    %29 = vector.shape_cast %28 : vector<2x1x128xf32> to vector<2x128xf32>
    %c0_18 = arith.constant 0 : index
    %c0_19 = arith.constant 0 : index
    %c0_20 = arith.constant 0 : index
    %30 = vector.load %arg1[%c0_18, %c0_19, %c0_20] : memref<2x2x32xf32, #tpu.memory_space<vmem>>, vector<1x2x32xf32>
    %31 = vector.shape_cast %30 : vector<1x2x32xf32> to vector<2x32xf32>
    %c1 = arith.constant 1 : index
    %c0_21 = arith.constant 0 : index
    %c0_22 = arith.constant 0 : index
    %32 = vector.load %arg1[%c1, %c0_21, %c0_22] : memref<2x2x32xf32, #tpu.memory_space<vmem>>, vector<1x2x32xf32>
    %33 = vector.shape_cast %32 : vector<1x2x32xf32> to vector<2x32xf32>
    %c0_23 = arith.constant 0 : index
    %c0_24 = arith.constant 0 : index
    %c0_25 = arith.constant 0 : index
    %34 = vector.load %arg2[%c0_23, %c0_24, %c0_25] : memref<2x2x32xf32, #tpu.memory_space<vmem>>, vector<1x2x32xf32>
    %35 = vector.shape_cast %34 : vector<1x2x32xf32> to vector<2x32xf32>
    %c1_26 = arith.constant 1 : index
    %c0_27 = arith.constant 0 : index
    %c0_28 = arith.constant 0 : index
    %36 = vector.load %arg2[%c1_26, %c0_27, %c0_28] : memref<2x2x32xf32, #tpu.memory_space<vmem>>, vector<1x2x32xf32>
    %37 = vector.shape_cast %36 : vector<1x2x32xf32> to vector<2x32xf32>
    %cst_29 = arith.constant dense<0.000000e+00> : vector<2x128xf32>
    %38 = tpu.matmul %31, %2, %cst_29 {dimension_numbers = #tpu.dot_dimension_numbers<[1], [0], [0], [1], [0, 0, 1, 1], [], []>} : vector<2x32xf32>, vector<32x128xf32>, vector<2x128xf32> -> vector<2x128xf32>
    %39 = arith.addf %15, %38 : vector<2x128xf32>
    %cst_30 = arith.constant 5.000000e-01 : f32
    %40 = vector.broadcast %cst_30 : f32 to vector<2x128xf32>
    %41 = arith.mulf %40, %39 : vector<2x128xf32>
    %42 = math.tanh %41 : vector<2x128xf32>
    %cst_31 = arith.constant 1.000000e+00 : f32
    %43 = vector.broadcast %cst_31 : f32 to vector<2x128xf32>
    %44 = arith.addf %42, %43 : vector<2x128xf32>
    %cst_32 = arith.constant 5.000000e-01 : f32
    %45 = vector.broadcast %cst_32 : f32 to vector<2x128xf32>
    %46 = arith.mulf %45, %44 : vector<2x128xf32>
    %47 = vector.extract_strided_slice %39 {offsets = [0, 96], sizes = [2, 32], strides = [1, 1]} : vector<2x128xf32> to vector<2x32xf32>
    %48 = math.tanh %47 : vector<2x32xf32>
    %49 = vector.extract_strided_slice %46 {offsets = [0, 0], sizes = [2, 32], strides = [1, 1]} : vector<2x128xf32> to vector<2x32xf32>
    %50 = vector.extract_strided_slice %46 {offsets = [0, 32], sizes = [2, 32], strides = [1, 1]} : vector<2x128xf32> to vector<2x32xf32>
    %51 = vector.extract_strided_slice %46 {offsets = [0, 64], sizes = [2, 32], strides = [1, 1]} : vector<2x128xf32> to vector<2x32xf32>
    %52 = arith.mulf %50, %35 : vector<2x32xf32>
    %53 = arith.mulf %49, %48 : vector<2x32xf32>
    %54 = arith.addf %52, %53 : vector<2x32xf32>
    %55 = math.tanh %54 : vector<2x32xf32>
    %56 = arith.mulf %51, %55 : vector<2x32xf32>
    %c0_33 = arith.constant 0 : index
    %c0_34 = arith.constant 0 : index
    %c0_35 = arith.constant 0 : index
    %c0_36 = arith.constant 0 : index
    %57 = vector.load %arg12[%c0_33, %c0_34, %c0_35, %c0_36] : memref<2x8x2x32xf32, #tpu.memory_space<vmem>>, vector<1x1x2x32xf32>
    %58 = vector.shape_cast %57 : vector<1x1x2x32xf32> to vector<2x32xf32>
    %59 = vector.shape_cast %56 : vector<2x32xf32> to vector<1x1x2x32xf32>
    tpu.vector_store %arg12[%c0_33, %c0_34, %c0_35, %c0_36], %59 {strides = array<i32>} : memref<2x8x2x32xf32, #tpu.memory_space<vmem>>, vector<1x1x2x32xf32>,
    %c0_37 = arith.constant 0 : index
    %c0_38 = arith.constant 0 : index
    %c0_39 = arith.constant 0 : index
    %c0_40 = arith.constant 0 : index
    %60 = vector.load %arg13[%c0_37, %c0_38, %c0_39, %c0_40] : memref<2x8x2x32xf32, #tpu.memory_space<vmem>>, vector<1x1x2x32xf32>
    %61 = vector.shape_cast %60 : vector<1x1x2x32xf32> to vector<2x32xf32>
    %62 = vector.shape_cast %54 : vector<2x32xf32> to vector<1x1x2x32xf32>
    tpu.vector_store %arg13[%c0_37, %c0_38, %c0_39, %c0_40], %62 {strides = array<i32>} : memref<2x8x2x32xf32, #tpu.memory_space<vmem>>, vector<1x1x2x32xf32>,
    %cst_41 = arith.constant dense<0.000000e+00> : vector<2x128xf32>
    %63 = tpu.matmul %56, %1, %cst_41 {dimension_numbers = #tpu.dot_dimension_numbers<[1], [0], [0], [1], [0, 0, 1, 1], [], []>} : vector<2x32xf32>, vector<32x128xf32>, vector<2x128xf32> -> vector<2x128xf32>
    %cst_42 = arith.constant dense<0.000000e+00> : vector<2x128xf32>
    %64 = tpu.matmul %33, %3, %cst_42 {dimension_numbers = #tpu.dot_dimension_numbers<[1], [0], [0], [1], [0, 0, 1, 1], [], []>} : vector<2x32xf32>, vector<32x128xf32>, vector<2x128xf32> -> vector<2x128xf32>
    %65 = arith.addf %63, %64 : vector<2x128xf32>
    %66 = vector.broadcast %5 : vector<1x128xf32> to vector<2x128xf32>
    %67 = arith.addf %65, %66 : vector<2x128xf32>
    %cst_43 = arith.constant 5.000000e-01 : f32
    %68 = vector.broadcast %cst_43 : f32 to vector<2x128xf32>
    %69 = arith.mulf %68, %67 : vector<2x128xf32>
    %70 = math.tanh %69 : vector<2x128xf32>
    %cst_44 = arith.constant 1.000000e+00 : f32
    %71 = vector.broadcast %cst_44 : f32 to vector<2x128xf32>
    %72 = arith.addf %70, %71 : vector<2x128xf32>
    %cst_45 = arith.constant 5.000000e-01 : f32
    %73 = vector.broadcast %cst_45 : f32 to vector<2x128xf32>
    %74 = arith.mulf %73, %72 : vector<2x128xf32>
    %75 = vector.extract_strided_slice %67 {offsets = [0, 96], sizes = [2, 32], strides = [1, 1]} : vector<2x128xf32> to vector<2x32xf32>
    %76 = math.tanh %75 : vector<2x32xf32>
    %77 = vector.extract_strided_slice %74 {offsets = [0, 0], sizes = [2, 32], strides = [1, 1]} : vector<2x128xf32> to vector<2x32xf32>
    %78 = vector.extract_strided_slice %74 {offsets = [0, 32], sizes = [2, 32], strides = [1, 1]} : vector<2x128xf32> to vector<2x32xf32>
    %79 = vector.extract_strided_slice %74 {offsets = [0, 64], sizes = [2, 32], strides = [1, 1]} : vector<2x128xf32> to vector<2x32xf32>
    %80 = arith.mulf %78, %37 : vector<2x32xf32>
    %81 = arith.mulf %77, %76 : vector<2x32xf32>
    %82 = arith.addf %80, %81 : vector<2x32xf32>
    %83 = math.tanh %82 : vector<2x32xf32>
    %84 = arith.mulf %79, %83 : vector<2x32xf32>
    %c1_46 = arith.constant 1 : index
    %c0_47 = arith.constant 0 : index
    %c0_48 = arith.constant 0 : index
    %c0_49 = arith.constant 0 : index
    %85 = vector.load %arg12[%c1_46, %c0_47, %c0_48, %c0_49] : memref<2x8x2x32xf32, #tpu.memory_space<vmem>>, vector<1x1x2x32xf32>
    %86 = vector.shape_cast %85 : vector<1x1x2x32xf32> to vector<2x32xf32>
    %87 = vector.shape_cast %84 : vector<2x32xf32> to vector<1x1x2x32xf32>
    tpu.vector_store %arg12[%c1_46, %c0_47, %c0_48, %c0_49], %87 {strides = array<i32>} : memref<2x8x2x32xf32, #tpu.memory_space<vmem>>, vector<1x1x2x32xf32>,
    %c1_50 = arith.constant 1 : index
    %c0_51 = arith.constant 0 : index
    %c0_52 = arith.constant 0 : index
    %c0_53 = arith.constant 0 : index
    %88 = vector.load %arg13[%c1_50, %c0_51, %c0_52, %c0_53] : memref<2x8x2x32xf32, #tpu.memory_space<vmem>>, vector<1x1x2x32xf32>
    %89 = vector.shape_cast %88 : vector<1x1x2x32xf32> to vector<2x32xf32>
    %90 = vector.shape_cast %82 : vector<2x32xf32> to vector<1x1x2x32xf32>
    tpu.vector_store %arg13[%c1_50, %c0_51, %c0_52, %c0_53], %90 {strides = array<i32>} : memref<2x8x2x32xf32, #tpu.memory_space<vmem>>, vector<1x1x2x32xf32>,
    %cst_54 = arith.constant dense<0.000000e+00> : vector<2x128xf32>
    %91 = tpu.matmul %56, %2, %cst_54 {dimension_numbers = #tpu.dot_dimension_numbers<[1], [0], [0], [1], [0, 0, 1, 1], [], []>} : vector<2x32xf32>, vector<32x128xf32>, vector<2x128xf32> -> vector<2x128xf32>
    %92 = arith.addf %17, %91 : vector<2x128xf32>
    %cst_55 = arith.constant 5.000000e-01 : f32
    %93 = vector.broadcast %cst_55 : f32 to vector<2x128xf32>
    %94 = arith.mulf %93, %92 : vector<2x128xf32>
    %95 = math.tanh %94 : vector<2x128xf32>
    %cst_56 = arith.constant 1.000000e+00 : f32
    %96 = vector.broadcast %cst_56 : f32 to vector<2x128xf32>
    %97 = arith.addf %95, %96 : vector<2x128xf32>
    %cst_57 = arith.constant 5.000000e-01 : f32
    %98 = vector.broadcast %cst_57 : f32 to vector<2x128xf32>
    %99 = arith.mulf %98, %97 : vector<2x128xf32>
    %100 = vector.extract_strided_slice %92 {offsets = [0, 96], sizes = [2, 32], strides = [1, 1]} : vector<2x128xf32> to vector<2x32xf32>
    %101 = math.tanh %100 : vector<2x32xf32>
    %102 = vector.extract_strided_slice %99 {offsets = [0, 0], sizes = [2, 32], strides = [1, 1]} : vector<2x128xf32> to vector<2x32xf32>
    %103 = vector.extract_strided_slice %99 {offsets = [0, 32], sizes = [2, 32], strides = [1, 1]} : vector<2x128xf32> to vector<2x32xf32>
    %104 = vector.extract_strided_slice %99 {offsets = [0, 64], sizes = [2, 32], strides = [1, 1]} : vector<2x128xf32> to vector<2x32xf32>
    %105 = arith.mulf %103, %54 : vector<2x32xf32>
    %106 = arith.mulf %102, %101 : vector<2x32xf32>
    %107 = arith.addf %105, %106 : vector<2x32xf32>
    %108 = math.tanh %107 : vector<2x32xf32>
    %109 = arith.mulf %104, %108 : vector<2x32xf32>
    %c0_58 = arith.constant 0 : index
    %c1_59 = arith.constant 1 : index
    %c0_60 = arith.constant 0 : index
    %c0_61 = arith.constant 0 : index
    %110 = vector.load %arg12[%c0_58, %c1_59, %c0_60, %c0_61] : memref<2x8x2x32xf32, #tpu.memory_space<vmem>>, vector<1x1x2x32xf32>
    %111 = vector.shape_cast %110 : vector<1x1x2x32xf32> to vector<2x32xf32>
    %112 = vector.shape_cast %109 : vector<2x32xf32> to vector<1x1x2x32xf32>
    tpu.vector_store %arg12[%c0_58, %c1_59, %c0_60, %c0_61], %112 {strides = array<i32>} : memref<2x8x2x32xf32, #tpu.memory_space<vmem>>, vector<1x1x2x32xf32>,
    %c0_62 = arith.constant 0 : index
    %c1_63 = arith.constant 1 : index
    %c0_64 = arith.constant 0 : index
    %c0_65 = arith.constant 0 : index
    %113 = vector.load %arg13[%c0_62, %c1_63, %c0_64, %c0_65] : memref<2x8x2x32xf32, #tpu.memory_space<vmem>>, vector<1x1x2x32xf32>
    %114 = vector.shape_cast %113 : vector<1x1x2x32xf32> to vector<2x32xf32>
    %115 = vector.shape_cast %107 : vector<2x32xf32> to vector<1x1x2x32xf32>
    tpu.vector_store %arg13[%c0_62, %c1_63, %c0_64, %c0_65], %115 {strides = array<i32>} : memref<2x8x2x32xf32, #tpu.memory_space<vmem>>, vector<1x1x2x32xf32>,
    %cst_66 = arith.constant dense<0.000000e+00> : vector<2x128xf32>
    %116 = tpu.matmul %109, %1, %cst_66 {dimension_numbers = #tpu.dot_dimension_numbers<[1], [0], [0], [1], [0, 0, 1, 1], [], []>} : vector<2x32xf32>, vector<32x128xf32>, vector<2x128xf32> -> vector<2x128xf32>
    %cst_67 = arith.constant dense<0.000000e+00> : vector<2x128xf32>
    %117 = tpu.matmul %84, %3, %cst_67 {dimension_numbers = #tpu.dot_dimension_numbers<[1], [0], [0], [1], [0, 0, 1, 1], [], []>} : vector<2x32xf32>, vector<32x128xf32>, vector<2x128xf32> -> vector<2x128xf32>
    %118 = arith.addf %116, %117 : vector<2x128xf32>
    %119 = vector.broadcast %5 : vector<1x128xf32> to vector<2x128xf32>
    %120 = arith.addf %118, %119 : vector<2x128xf32>
    %cst_68 = arith.constant 5.000000e-01 : f32
    %121 = vector.broadcast %cst_68 : f32 to vector<2x128xf32>
    %122 = arith.mulf %121, %120 : vector<2x128xf32>
    %123 = math.tanh %122 : vector<2x128xf32>
    %cst_69 = arith.constant 1.000000e+00 : f32
    %124 = vector.broadcast %cst_69 : f32 to vector<2x128xf32>
    %125 = arith.addf %123, %124 : vector<2x128xf32>
    %cst_70 = arith.constant 5.000000e-01 : f32
    %126 = vector.broadcast %cst_70 : f32 to vector<2x128xf32>
    %127 = arith.mulf %126, %125 : vector<2x128xf32>
    %128 = vector.extract_strided_slice %120 {offsets = [0, 96], sizes = [2, 32], strides = [1, 1]} : vector<2x128xf32> to vector<2x32xf32>
    %129 = math.tanh %128 : vector<2x32xf32>
    %130 = vector.extract_strided_slice %127 {offsets = [0, 0], sizes = [2, 32], strides = [1, 1]} : vector<2x128xf32> to vector<2x32xf32>
    %131 = vector.extract_strided_slice %127 {offsets = [0, 32], sizes = [2, 32], strides = [1, 1]} : vector<2x128xf32> to vector<2x32xf32>
    %132 = vector.extract_strided_slice %127 {offsets = [0, 64], sizes = [2, 32], strides = [1, 1]} : vector<2x128xf32> to vector<2x32xf32>
    %133 = arith.mulf %131, %82 : vector<2x32xf32>
    %134 = arith.mulf %130, %129 : vector<2x32xf32>
    %135 = arith.addf %133, %134 : vector<2x32xf32>
    %136 = math.tanh %135 : vector<2x32xf32>
    %137 = arith.mulf %132, %136 : vector<2x32xf32>
    %c1_71 = arith.constant 1 : index
    %c1_72 = arith.constant 1 : index
    %c0_73 = arith.constant 0 : index
    %c0_74 = arith.constant 0 : index
    %138 = vector.load %arg12[%c1_71, %c1_72, %c0_73, %c0_74] : memref<2x8x2x32xf32, #tpu.memory_space<vmem>>, vector<1x1x2x32xf32>
    %139 = vector.shape_cast %138 : vector<1x1x2x32xf32> to vector<2x32xf32>
    %140 = vector.shape_cast %137 : vector<2x32xf32> to vector<1x1x2x32xf32>
    tpu.vector_store %arg12[%c1_71, %c1_72, %c0_73, %c0_74], %140 {strides = array<i32>} : memref<2x8x2x32xf32, #tpu.memory_space<vmem>>, vector<1x1x2x32xf32>,
    %c1_75 = arith.constant 1 : index
    %c1_76 = arith.constant 1 : index
    %c0_77 = arith.constant 0 : index
    %c0_78 = arith.constant 0 : index
    %141 = vector.load %arg13[%c1_75, %c1_76, %c0_77, %c0_78] : memref<2x8x2x32xf32, #tpu.memory_space<vmem>>, vector<1x1x2x32xf32>
    %142 = vector.shape_cast %141 : vector<1x1x2x32xf32> to vector<2x32xf32>
    %143 = vector.shape_cast %135 : vector<2x32xf32> to vector<1x1x2x32xf32>
    tpu.vector_store %arg13[%c1_75, %c1_76, %c0_77, %c0_78], %143 {strides = array<i32>} : memref<2x8x2x32xf32, #tpu.memory_space<vmem>>, vector<1x1x2x32xf32>,
    %cst_79 = arith.constant dense<0.000000e+00> : vector<2x128xf32>
    %144 = tpu.matmul %109, %2, %cst_79 {dimension_numbers = #tpu.dot_dimension_numbers<[1], [0], [0], [1], [0, 0, 1, 1], [], []>} : vector<2x32xf32>, vector<32x128xf32>, vector<2x128xf32> -> vector<2x128xf32>
    %145 = arith.addf %19, %144 : vector<2x128xf32>
    %cst_80 = arith.constant 5.000000e-01 : f32
    %146 = vector.broadcast %cst_80 : f32 to vector<2x128xf32>
    %147 = arith.mulf %146, %145 : vector<2x128xf32>
    %148 = math.tanh %147 : vector<2x128xf32>
    %cst_81 = arith.constant 1.000000e+00 : f32
    %149 = vector.broadcast %cst_81 : f32 to vector<2x128xf32>
    %150 = arith.addf %148, %149 : vector<2x128xf32>
    %cst_82 = arith.constant 5.000000e-01 : f32
    %151 = vector.broadcast %cst_82 : f32 to vector<2x128xf32>
    %152 = arith.mulf %151, %150 : vector<2x128xf32>
    %153 = vector.extract_strided_slice %145 {offsets = [0, 96], sizes = [2, 32], strides = [1, 1]} : vector<2x128xf32> to vector<2x32xf32>
    %154 = math.tanh %153 : vector<2x32xf32>
    %155 = vector.extract_strided_slice %152 {offsets = [0, 0], sizes = [2, 32], strides = [1, 1]} : vector<2x128xf32> to vector<2x32xf32>
    %156 = vector.extract_strided_slice %152 {offsets = [0, 32], sizes = [2, 32], strides = [1, 1]} : vector<2x128xf32> to vector<2x32xf32>
    %157 = vector.extract_strided_slice %152 {offsets = [0, 64], sizes = [2, 32], strides = [1, 1]} : vector<2x128xf32> to vector<2x32xf32>
    %158 = arith.mulf %156, %107 : vector<2x32xf32>
    %159 = arith.mulf %155, %154 : vector<2x32xf32>
    %160 = arith.addf %158, %159 : vector<2x32xf32>
    %161 = math.tanh %160 : vector<2x32xf32>
    %162 = arith.mulf %157, %161 : vector<2x32xf32>
    %c0_83 = arith.constant 0 : index
    %c2 = arith.constant 2 : index
    %c0_84 = arith.constant 0 : index
    %c0_85 = arith.constant 0 : index
    %163 = vector.load %arg12[%c0_83, %c2, %c0_84, %c0_85] : memref<2x8x2x32xf32, #tpu.memory_space<vmem>>, vector<1x1x2x32xf32>
    %164 = vector.shape_cast %163 : vector<1x1x2x32xf32> to vector<2x32xf32>
    %165 = vector.shape_cast %162 : vector<2x32xf32> to vector<1x1x2x32xf32>
    tpu.vector_store %arg12[%c0_83, %c2, %c0_84, %c0_85], %165 {strides = array<i32>} : memref<2x8x2x32xf32, #tpu.memory_space<vmem>>, vector<1x1x2x32xf32>,
    %c0_86 = arith.constant 0 : index
    %c2_87 = arith.constant 2 : index
    %c0_88 = arith.constant 0 : index
    %c0_89 = arith.constant 0 : index
    %166 = vector.load %arg13[%c0_86, %c2_87, %c0_88, %c0_89] : memref<2x8x2x32xf32, #tpu.memory_space<vmem>>, vector<1x1x2x32xf32>
    %167 = vector.shape_cast %166 : vector<1x1x2x32xf32> to vector<2x32xf32>
    %168 = vector.shape_cast %160 : vector<2x32xf32> to vector<1x1x2x32xf32>
    tpu.vector_store %arg13[%c0_86, %c2_87, %c0_88, %c0_89], %168 {strides = array<i32>} : memref<2x8x2x32xf32, #tpu.memory_space<vmem>>, vector<1x1x2x32xf32>,
    %cst_90 = arith.constant dense<0.000000e+00> : vector<2x128xf32>
    %169 = tpu.matmul %162, %1, %cst_90 {dimension_numbers = #tpu.dot_dimension_numbers<[1], [0], [0], [1], [0, 0, 1, 1], [], []>} : vector<2x32xf32>, vector<32x128xf32>, vector<2x128xf32> -> vector<2x128xf32>
    %cst_91 = arith.constant dense<0.000000e+00> : vector<2x128xf32>
    %170 = tpu.matmul %137, %3, %cst_91 {dimension_numbers = #tpu.dot_dimension_numbers<[1], [0], [0], [1], [0, 0, 1, 1], [], []>} : vector<2x32xf32>, vector<32x128xf32>, vector<2x128xf32> -> vector<2x128xf32>
    %171 = arith.addf %169, %170 : vector<2x128xf32>
    %172 = vector.broadcast %5 : vector<1x128xf32> to vector<2x128xf32>
    %173 = arith.addf %171, %172 : vector<2x128xf32>
    %cst_92 = arith.constant 5.000000e-01 : f32
    %174 = vector.broadcast %cst_92 : f32 to vector<2x128xf32>
    %175 = arith.mulf %174, %173 : vector<2x128xf32>
    %176 = math.tanh %175 : vector<2x128xf32>
    %cst_93 = arith.constant 1.000000e+00 : f32
    %177 = vector.broadcast %cst_93 : f32 to vector<2x128xf32>
    %178 = arith.addf %176, %177 : vector<2x128xf32>
    %cst_94 = arith.constant 5.000000e-01 : f32
    %179 = vector.broadcast %cst_94 : f32 to vector<2x128xf32>
    %180 = arith.mulf %179, %178 : vector<2x128xf32>
    %181 = vector.extract_strided_slice %173 {offsets = [0, 96], sizes = [2, 32], strides = [1, 1]} : vector<2x128xf32> to vector<2x32xf32>
    %182 = math.tanh %181 : vector<2x32xf32>
    %183 = vector.extract_strided_slice %180 {offsets = [0, 0], sizes = [2, 32], strides = [1, 1]} : vector<2x128xf32> to vector<2x32xf32>
    %184 = vector.extract_strided_slice %180 {offsets = [0, 32], sizes = [2, 32], strides = [1, 1]} : vector<2x128xf32> to vector<2x32xf32>
    %185 = vector.extract_strided_slice %180 {offsets = [0, 64], sizes = [2, 32], strides = [1, 1]} : vector<2x128xf32> to vector<2x32xf32>
    %186 = arith.mulf %184, %135 : vector<2x32xf32>
    %187 = arith.mulf %183, %182 : vector<2x32xf32>
    %188 = arith.addf %186, %187 : vector<2x32xf32>
    %189 = math.tanh %188 : vector<2x32xf32>
    %190 = arith.mulf %185, %189 : vector<2x32xf32>
    %c1_95 = arith.constant 1 : index
    %c2_96 = arith.constant 2 : index
    %c0_97 = arith.constant 0 : index
    %c0_98 = arith.constant 0 : index
    %191 = vector.load %arg12[%c1_95, %c2_96, %c0_97, %c0_98] : memref<2x8x2x32xf32, #tpu.memory_space<vmem>>, vector<1x1x2x32xf32>
    %192 = vector.shape_cast %191 : vector<1x1x2x32xf32> to vector<2x32xf32>
    %193 = vector.shape_cast %190 : vector<2x32xf32> to vector<1x1x2x32xf32>
    tpu.vector_store %arg12[%c1_95, %c2_96, %c0_97, %c0_98], %193 {strides = array<i32>} : memref<2x8x2x32xf32, #tpu.memory_space<vmem>>, vector<1x1x2x32xf32>,
    %c1_99 = arith.constant 1 : index
    %c2_100 = arith.constant 2 : index
    %c0_101 = arith.constant 0 : index
    %c0_102 = arith.constant 0 : index
    %194 = vector.load %arg13[%c1_99, %c2_100, %c0_101, %c0_102] : memref<2x8x2x32xf32, #tpu.memory_space<vmem>>, vector<1x1x2x32xf32>
    %195 = vector.shape_cast %194 : vector<1x1x2x32xf32> to vector<2x32xf32>
    %196 = vector.shape_cast %188 : vector<2x32xf32> to vector<1x1x2x32xf32>
    tpu.vector_store %arg13[%c1_99, %c2_100, %c0_101, %c0_102], %196 {strides = array<i32>} : memref<2x8x2x32xf32, #tpu.memory_space<vmem>>, vector<1x1x2x32xf32>,
    %cst_103 = arith.constant dense<0.000000e+00> : vector<2x128xf32>
    %197 = tpu.matmul %162, %2, %cst_103 {dimension_numbers = #tpu.dot_dimension_numbers<[1], [0], [0], [1], [0, 0, 1, 1], [], []>} : vector<2x32xf32>, vector<32x128xf32>, vector<2x128xf32> -> vector<2x128xf32>
    %198 = arith.addf %21, %197 : vector<2x128xf32>
    %cst_104 = arith.constant 5.000000e-01 : f32
    %199 = vector.broadcast %cst_104 : f32 to vector<2x128xf32>
    %200 = arith.mulf %199, %198 : vector<2x128xf32>
    %201 = math.tanh %200 : vector<2x128xf32>
    %cst_105 = arith.constant 1.000000e+00 : f32
    %202 = vector.broadcast %cst_105 : f32 to vector<2x128xf32>
    %203 = arith.addf %201, %202 : vector<2x128xf32>
    %cst_106 = arith.constant 5.000000e-01 : f32
    %204 = vector.broadcast %cst_106 : f32 to vector<2x128xf32>
    %205 = arith.mulf %204, %203 : vector<2x128xf32>
    %206 = vector.extract_strided_slice %198 {offsets = [0, 96], sizes = [2, 32], strides = [1, 1]} : vector<2x128xf32> to vector<2x32xf32>
    %207 = math.tanh %206 : vector<2x32xf32>
    %208 = vector.extract_strided_slice %205 {offsets = [0, 0], sizes = [2, 32], strides = [1, 1]} : vector<2x128xf32> to vector<2x32xf32>
    %209 = vector.extract_strided_slice %205 {offsets = [0, 32], sizes = [2, 32], strides = [1, 1]} : vector<2x128xf32> to vector<2x32xf32>
    %210 = vector.extract_strided_slice %205 {offsets = [0, 64], sizes = [2, 32], strides = [1, 1]} : vector<2x128xf32> to vector<2x32xf32>
    %211 = arith.mulf %209, %160 : vector<2x32xf32>
    %212 = arith.mulf %208, %207 : vector<2x32xf32>
    %213 = arith.addf %211, %212 : vector<2x32xf32>
    %214 = math.tanh %213 : vector<2x32xf32>
    %215 = arith.mulf %210, %214 : vector<2x32xf32>
    %c0_107 = arith.constant 0 : index
    %c3 = arith.constant 3 : index
    %c0_108 = arith.constant 0 : index
    %c0_109 = arith.constant 0 : index
    %216 = vector.load %arg12[%c0_107, %c3, %c0_108, %c0_109] : memref<2x8x2x32xf32, #tpu.memory_space<vmem>>, vector<1x1x2x32xf32>
    %217 = vector.shape_cast %216 : vector<1x1x2x32xf32> to vector<2x32xf32>
    %218 = vector.shape_cast %215 : vector<2x32xf32> to vector<1x1x2x32xf32>
    tpu.vector_store %arg12[%c0_107, %c3, %c0_108, %c0_109], %218 {strides = array<i32>} : memref<2x8x2x32xf32, #tpu.memory_space<vmem>>, vector<1x1x2x32xf32>,
    %c0_110 = arith.constant 0 : index
    %c3_111 = arith.constant 3 : index
    %c0_112 = arith.constant 0 : index
    %c0_113 = arith.constant 0 : index
    %219 = vector.load %arg13[%c0_110, %c3_111, %c0_112, %c0_113] : memref<2x8x2x32xf32, #tpu.memory_space<vmem>>, vector<1x1x2x32xf32>
    %220 = vector.shape_cast %219 : vector<1x1x2x32xf32> to vector<2x32xf32>
    %221 = vector.shape_cast %213 : vector<2x32xf32> to vector<1x1x2x32xf32>
    tpu.vector_store %arg13[%c0_110, %c3_111, %c0_112, %c0_113], %221 {strides = array<i32>} : memref<2x8x2x32xf32, #tpu.memory_space<vmem>>, vector<1x1x2x32xf32>,
    %cst_114 = arith.constant dense<0.000000e+00> : vector<2x128xf32>
    %222 = tpu.matmul %215, %1, %cst_114 {dimension_numbers = #tpu.dot_dimension_numbers<[1], [0], [0], [1], [0, 0, 1, 1], [], []>} : vector<2x32xf32>, vector<32x128xf32>, vector<2x128xf32> -> vector<2x128xf32>
    %cst_115 = arith.constant dense<0.000000e+00> : vector<2x128xf32>
    %223 = tpu.matmul %190, %3, %cst_115 {dimension_numbers = #tpu.dot_dimension_numbers<[1], [0], [0], [1], [0, 0, 1, 1], [], []>} : vector<2x32xf32>, vector<32x128xf32>, vector<2x128xf32> -> vector<2x128xf32>
    %224 = arith.addf %222, %223 : vector<2x128xf32>
    %225 = vector.broadcast %5 : vector<1x128xf32> to vector<2x128xf32>
    %226 = arith.addf %224, %225 : vector<2x128xf32>
    %cst_116 = arith.constant 5.000000e-01 : f32
    %227 = vector.broadcast %cst_116 : f32 to vector<2x128xf32>
    %228 = arith.mulf %227, %226 : vector<2x128xf32>
    %229 = math.tanh %228 : vector<2x128xf32>
    %cst_117 = arith.constant 1.000000e+00 : f32
    %230 = vector.broadcast %cst_117 : f32 to vector<2x128xf32>
    %231 = arith.addf %229, %230 : vector<2x128xf32>
    %cst_118 = arith.constant 5.000000e-01 : f32
    %232 = vector.broadcast %cst_118 : f32 to vector<2x128xf32>
    %233 = arith.mulf %232, %231 : vector<2x128xf32>
    %234 = vector.extract_strided_slice %226 {offsets = [0, 96], sizes = [2, 32], strides = [1, 1]} : vector<2x128xf32> to vector<2x32xf32>
    %235 = math.tanh %234 : vector<2x32xf32>
    %236 = vector.extract_strided_slice %233 {offsets = [0, 0], sizes = [2, 32], strides = [1, 1]} : vector<2x128xf32> to vector<2x32xf32>
    %237 = vector.extract_strided_slice %233 {offsets = [0, 32], sizes = [2, 32], strides = [1, 1]} : vector<2x128xf32> to vector<2x32xf32>
    %238 = vector.extract_strided_slice %233 {offsets = [0, 64], sizes = [2, 32], strides = [1, 1]} : vector<2x128xf32> to vector<2x32xf32>
    %239 = arith.mulf %237, %188 : vector<2x32xf32>
    %240 = arith.mulf %236, %235 : vector<2x32xf32>
    %241 = arith.addf %239, %240 : vector<2x32xf32>
    %242 = math.tanh %241 : vector<2x32xf32>
    %243 = arith.mulf %238, %242 : vector<2x32xf32>
    %c1_119 = arith.constant 1 : index
    %c3_120 = arith.constant 3 : index
    %c0_121 = arith.constant 0 : index
    %c0_122 = arith.constant 0 : index
    %244 = vector.load %arg12[%c1_119, %c3_120, %c0_121, %c0_122] : memref<2x8x2x32xf32, #tpu.memory_space<vmem>>, vector<1x1x2x32xf32>
    %245 = vector.shape_cast %244 : vector<1x1x2x32xf32> to vector<2x32xf32>
    %246 = vector.shape_cast %243 : vector<2x32xf32> to vector<1x1x2x32xf32>
    tpu.vector_store %arg12[%c1_119, %c3_120, %c0_121, %c0_122], %246 {strides = array<i32>} : memref<2x8x2x32xf32, #tpu.memory_space<vmem>>, vector<1x1x2x32xf32>,
    %c1_123 = arith.constant 1 : index
    %c3_124 = arith.constant 3 : index
    %c0_125 = arith.constant 0 : index
    %c0_126 = arith.constant 0 : index
    %247 = vector.load %arg13[%c1_123, %c3_124, %c0_125, %c0_126] : memref<2x8x2x32xf32, #tpu.memory_space<vmem>>, vector<1x1x2x32xf32>
    %248 = vector.shape_cast %247 : vector<1x1x2x32xf32> to vector<2x32xf32>
    %249 = vector.shape_cast %241 : vector<2x32xf32> to vector<1x1x2x32xf32>
    tpu.vector_store %arg13[%c1_123, %c3_124, %c0_125, %c0_126], %249 {strides = array<i32>} : memref<2x8x2x32xf32, #tpu.memory_space<vmem>>, vector<1x1x2x32xf32>,
    %cst_127 = arith.constant dense<0.000000e+00> : vector<2x128xf32>
    %250 = tpu.matmul %215, %2, %cst_127 {dimension_numbers = #tpu.dot_dimension_numbers<[1], [0], [0], [1], [0, 0, 1, 1], [], []>} : vector<2x32xf32>, vector<32x128xf32>, vector<2x128xf32> -> vector<2x128xf32>
    %251 = arith.addf %23, %250 : vector<2x128xf32>
    %cst_128 = arith.constant 5.000000e-01 : f32
    %252 = vector.broadcast %cst_128 : f32 to vector<2x128xf32>
    %253 = arith.mulf %252, %251 : vector<2x128xf32>
    %254 = math.tanh %253 : vector<2x128xf32>
    %cst_129 = arith.constant 1.000000e+00 : f32
    %255 = vector.broadcast %cst_129 : f32 to vector<2x128xf32>
    %256 = arith.addf %254, %255 : vector<2x128xf32>
    %cst_130 = arith.constant 5.000000e-01 : f32
    %257 = vector.broadcast %cst_130 : f32 to vector<2x128xf32>
    %258 = arith.mulf %257, %256 : vector<2x128xf32>
    %259 = vector.extract_strided_slice %251 {offsets = [0, 96], sizes = [2, 32], strides = [1, 1]} : vector<2x128xf32> to vector<2x32xf32>
    %260 = math.tanh %259 : vector<2x32xf32>
    %261 = vector.extract_strided_slice %258 {offsets = [0, 0], sizes = [2, 32], strides = [1, 1]} : vector<2x128xf32> to vector<2x32xf32>
    %262 = vector.extract_strided_slice %258 {offsets = [0, 32], sizes = [2, 32], strides = [1, 1]} : vector<2x128xf32> to vector<2x32xf32>
    %263 = vector.extract_strided_slice %258 {offsets = [0, 64], sizes = [2, 32], strides = [1, 1]} : vector<2x128xf32> to vector<2x32xf32>
    %264 = arith.mulf %262, %213 : vector<2x32xf32>
    %265 = arith.mulf %261, %260 : vector<2x32xf32>
    %266 = arith.addf %264, %265 : vector<2x32xf32>
    %267 = math.tanh %266 : vector<2x32xf32>
    %268 = arith.mulf %263, %267 : vector<2x32xf32>
    %c0_131 = arith.constant 0 : index
    %c4 = arith.constant 4 : index
    %c0_132 = arith.constant 0 : index
    %c0_133 = arith.constant 0 : index
    %269 = vector.load %arg12[%c0_131, %c4, %c0_132, %c0_133] : memref<2x8x2x32xf32, #tpu.memory_space<vmem>>, vector<1x1x2x32xf32>
    %270 = vector.shape_cast %269 : vector<1x1x2x32xf32> to vector<2x32xf32>
    %271 = vector.shape_cast %268 : vector<2x32xf32> to vector<1x1x2x32xf32>
    tpu.vector_store %arg12[%c0_131, %c4, %c0_132, %c0_133], %271 {strides = array<i32>} : memref<2x8x2x32xf32, #tpu.memory_space<vmem>>, vector<1x1x2x32xf32>,
    %c0_134 = arith.constant 0 : index
    %c4_135 = arith.constant 4 : index
    %c0_136 = arith.constant 0 : index
    %c0_137 = arith.constant 0 : index
    %272 = vector.load %arg13[%c0_134, %c4_135, %c0_136, %c0_137] : memref<2x8x2x32xf32, #tpu.memory_space<vmem>>, vector<1x1x2x32xf32>
    %273 = vector.shape_cast %272 : vector<1x1x2x32xf32> to vector<2x32xf32>
    %274 = vector.shape_cast %266 : vector<2x32xf32> to vector<1x1x2x32xf32>
    tpu.vector_store %arg13[%c0_134, %c4_135, %c0_136, %c0_137], %274 {strides = array<i32>} : memref<2x8x2x32xf32, #tpu.memory_space<vmem>>, vector<1x1x2x32xf32>,
    %cst_138 = arith.constant dense<0.000000e+00> : vector<2x128xf32>
    %275 = tpu.matmul %268, %1, %cst_138 {dimension_numbers = #tpu.dot_dimension_numbers<[1], [0], [0], [1], [0, 0, 1, 1], [], []>} : vector<2x32xf32>, vector<32x128xf32>, vector<2x128xf32> -> vector<2x128xf32>
    %cst_139 = arith.constant dense<0.000000e+00> : vector<2x128xf32>
    %276 = tpu.matmul %243, %3, %cst_139 {dimension_numbers = #tpu.dot_dimension_numbers<[1], [0], [0], [1], [0, 0, 1, 1], [], []>} : vector<2x32xf32>, vector<32x128xf32>, vector<2x128xf32> -> vector<2x128xf32>
    %277 = arith.addf %275, %276 : vector<2x128xf32>
    %278 = vector.broadcast %5 : vector<1x128xf32> to vector<2x128xf32>
    %279 = arith.addf %277, %278 : vector<2x128xf32>
    %cst_140 = arith.constant 5.000000e-01 : f32
    %280 = vector.broadcast %cst_140 : f32 to vector<2x128xf32>
    %281 = arith.mulf %280, %279 : vector<2x128xf32>
    %282 = math.tanh %281 : vector<2x128xf32>
    %cst_141 = arith.constant 1.000000e+00 : f32
    %283 = vector.broadcast %cst_141 : f32 to vector<2x128xf32>
    %284 = arith.addf %282, %283 : vector<2x128xf32>
    %cst_142 = arith.constant 5.000000e-01 : f32
    %285 = vector.broadcast %cst_142 : f32 to vector<2x128xf32>
    %286 = arith.mulf %285, %284 : vector<2x128xf32>
    %287 = vector.extract_strided_slice %279 {offsets = [0, 96], sizes = [2, 32], strides = [1, 1]} : vector<2x128xf32> to vector<2x32xf32>
    %288 = math.tanh %287 : vector<2x32xf32>
    %289 = vector.extract_strided_slice %286 {offsets = [0, 0], sizes = [2, 32], strides = [1, 1]} : vector<2x128xf32> to vector<2x32xf32>
    %290 = vector.extract_strided_slice %286 {offsets = [0, 32], sizes = [2, 32], strides = [1, 1]} : vector<2x128xf32> to vector<2x32xf32>
    %291 = vector.extract_strided_slice %286 {offsets = [0, 64], sizes = [2, 32], strides = [1, 1]} : vector<2x128xf32> to vector<2x32xf32>
    %292 = arith.mulf %290, %241 : vector<2x32xf32>
    %293 = arith.mulf %289, %288 : vector<2x32xf32>
    %294 = arith.addf %292, %293 : vector<2x32xf32>
    %295 = math.tanh %294 : vector<2x32xf32>
    %296 = arith.mulf %291, %295 : vector<2x32xf32>
    %c1_143 = arith.constant 1 : index
    %c4_144 = arith.constant 4 : index
    %c0_145 = arith.constant 0 : index
    %c0_146 = arith.constant 0 : index
    %297 = vector.load %arg12[%c1_143, %c4_144, %c0_145, %c0_146] : memref<2x8x2x32xf32, #tpu.memory_space<vmem>>, vector<1x1x2x32xf32>
    %298 = vector.shape_cast %297 : vector<1x1x2x32xf32> to vector<2x32xf32>
    %299 = vector.shape_cast %296 : vector<2x32xf32> to vector<1x1x2x32xf32>
    tpu.vector_store %arg12[%c1_143, %c4_144, %c0_145, %c0_146], %299 {strides = array<i32>} : memref<2x8x2x32xf32, #tpu.memory_space<vmem>>, vector<1x1x2x32xf32>,
    %c1_147 = arith.constant 1 : index
    %c4_148 = arith.constant 4 : index
    %c0_149 = arith.constant 0 : index
    %c0_150 = arith.constant 0 : index
    %300 = vector.load %arg13[%c1_147, %c4_148, %c0_149, %c0_150] : memref<2x8x2x32xf32, #tpu.memory_space<vmem>>, vector<1x1x2x32xf32>
    %301 = vector.shape_cast %300 : vector<1x1x2x32xf32> to vector<2x32xf32>
    %302 = vector.shape_cast %294 : vector<2x32xf32> to vector<1x1x2x32xf32>
    tpu.vector_store %arg13[%c1_147, %c4_148, %c0_149, %c0_150], %302 {strides = array<i32>} : memref<2x8x2x32xf32, #tpu.memory_space<vmem>>, vector<1x1x2x32xf32>,
    %cst_151 = arith.constant dense<0.000000e+00> : vector<2x128xf32>
    %303 = tpu.matmul %268, %2, %cst_151 {dimension_numbers = #tpu.dot_dimension_numbers<[1], [0], [0], [1], [0, 0, 1, 1], [], []>} : vector<2x32xf32>, vector<32x128xf32>, vector<2x128xf32> -> vector<2x128xf32>
    %304 = arith.addf %25, %303 : vector<2x128xf32>
    %cst_152 = arith.constant 5.000000e-01 : f32
    %305 = vector.broadcast %cst_152 : f32 to vector<2x128xf32>
    %306 = arith.mulf %305, %304 : vector<2x128xf32>
    %307 = math.tanh %306 : vector<2x128xf32>
    %cst_153 = arith.constant 1.000000e+00 : f32
    %308 = vector.broadcast %cst_153 : f32 to vector<2x128xf32>
    %309 = arith.addf %307, %308 : vector<2x128xf32>
    %cst_154 = arith.constant 5.000000e-01 : f32
    %310 = vector.broadcast %cst_154 : f32 to vector<2x128xf32>
    %311 = arith.mulf %310, %309 : vector<2x128xf32>
    %312 = vector.extract_strided_slice %304 {offsets = [0, 96], sizes = [2, 32], strides = [1, 1]} : vector<2x128xf32> to vector<2x32xf32>
    %313 = math.tanh %312 : vector<2x32xf32>
    %314 = vector.extract_strided_slice %311 {offsets = [0, 0], sizes = [2, 32], strides = [1, 1]} : vector<2x128xf32> to vector<2x32xf32>
    %315 = vector.extract_strided_slice %311 {offsets = [0, 32], sizes = [2, 32], strides = [1, 1]} : vector<2x128xf32> to vector<2x32xf32>
    %316 = vector.extract_strided_slice %311 {offsets = [0, 64], sizes = [2, 32], strides = [1, 1]} : vector<2x128xf32> to vector<2x32xf32>
    %317 = arith.mulf %315, %266 : vector<2x32xf32>
    %318 = arith.mulf %314, %313 : vector<2x32xf32>
    %319 = arith.addf %317, %318 : vector<2x32xf32>
    %320 = math.tanh %319 : vector<2x32xf32>
    %321 = arith.mulf %316, %320 : vector<2x32xf32>
    %c0_155 = arith.constant 0 : index
    %c5 = arith.constant 5 : index
    %c0_156 = arith.constant 0 : index
    %c0_157 = arith.constant 0 : index
    %322 = vector.load %arg12[%c0_155, %c5, %c0_156, %c0_157] : memref<2x8x2x32xf32, #tpu.memory_space<vmem>>, vector<1x1x2x32xf32>
    %323 = vector.shape_cast %322 : vector<1x1x2x32xf32> to vector<2x32xf32>
    %324 = vector.shape_cast %321 : vector<2x32xf32> to vector<1x1x2x32xf32>
    tpu.vector_store %arg12[%c0_155, %c5, %c0_156, %c0_157], %324 {strides = array<i32>} : memref<2x8x2x32xf32, #tpu.memory_space<vmem>>, vector<1x1x2x32xf32>,
    %c0_158 = arith.constant 0 : index
    %c5_159 = arith.constant 5 : index
    %c0_160 = arith.constant 0 : index
    %c0_161 = arith.constant 0 : index
    %325 = vector.load %arg13[%c0_158, %c5_159, %c0_160, %c0_161] : memref<2x8x2x32xf32, #tpu.memory_space<vmem>>, vector<1x1x2x32xf32>
    %326 = vector.shape_cast %325 : vector<1x1x2x32xf32> to vector<2x32xf32>
    %327 = vector.shape_cast %319 : vector<2x32xf32> to vector<1x1x2x32xf32>
    tpu.vector_store %arg13[%c0_158, %c5_159, %c0_160, %c0_161], %327 {strides = array<i32>} : memref<2x8x2x32xf32, #tpu.memory_space<vmem>>, vector<1x1x2x32xf32>,
    %cst_162 = arith.constant dense<0.000000e+00> : vector<2x128xf32>
    %328 = tpu.matmul %321, %1, %cst_162 {dimension_numbers = #tpu.dot_dimension_numbers<[1], [0], [0], [1], [0, 0, 1, 1], [], []>} : vector<2x32xf32>, vector<32x128xf32>, vector<2x128xf32> -> vector<2x128xf32>
    %cst_163 = arith.constant dense<0.000000e+00> : vector<2x128xf32>
    %329 = tpu.matmul %296, %3, %cst_163 {dimension_numbers = #tpu.dot_dimension_numbers<[1], [0], [0], [1], [0, 0, 1, 1], [], []>} : vector<2x32xf32>, vector<32x128xf32>, vector<2x128xf32> -> vector<2x128xf32>
    %330 = arith.addf %328, %329 : vector<2x128xf32>
    %331 = vector.broadcast %5 : vector<1x128xf32> to vector<2x128xf32>
    %332 = arith.addf %330, %331 : vector<2x128xf32>
    %cst_164 = arith.constant 5.000000e-01 : f32
    %333 = vector.broadcast %cst_164 : f32 to vector<2x128xf32>
    %334 = arith.mulf %333, %332 : vector<2x128xf32>
    %335 = math.tanh %334 : vector<2x128xf32>
    %cst_165 = arith.constant 1.000000e+00 : f32
    %336 = vector.broadcast %cst_165 : f32 to vector<2x128xf32>
    %337 = arith.addf %335, %336 : vector<2x128xf32>
    %cst_166 = arith.constant 5.000000e-01 : f32
    %338 = vector.broadcast %cst_166 : f32 to vector<2x128xf32>
    %339 = arith.mulf %338, %337 : vector<2x128xf32>
    %340 = vector.extract_strided_slice %332 {offsets = [0, 96], sizes = [2, 32], strides = [1, 1]} : vector<2x128xf32> to vector<2x32xf32>
    %341 = math.tanh %340 : vector<2x32xf32>
    %342 = vector.extract_strided_slice %339 {offsets = [0, 0], sizes = [2, 32], strides = [1, 1]} : vector<2x128xf32> to vector<2x32xf32>
    %343 = vector.extract_strided_slice %339 {offsets = [0, 32], sizes = [2, 32], strides = [1, 1]} : vector<2x128xf32> to vector<2x32xf32>
    %344 = vector.extract_strided_slice %339 {offsets = [0, 64], sizes = [2, 32], strides = [1, 1]} : vector<2x128xf32> to vector<2x32xf32>
    %345 = arith.mulf %343, %294 : vector<2x32xf32>
    %346 = arith.mulf %342, %341 : vector<2x32xf32>
    %347 = arith.addf %345, %346 : vector<2x32xf32>
    %348 = math.tanh %347 : vector<2x32xf32>
    %349 = arith.mulf %344, %348 : vector<2x32xf32>
    %c1_167 = arith.constant 1 : index
    %c5_168 = arith.constant 5 : index
    %c0_169 = arith.constant 0 : index
    %c0_170 = arith.constant 0 : index
    %350 = vector.load %arg12[%c1_167, %c5_168, %c0_169, %c0_170] : memref<2x8x2x32xf32, #tpu.memory_space<vmem>>, vector<1x1x2x32xf32>
    %351 = vector.shape_cast %350 : vector<1x1x2x32xf32> to vector<2x32xf32>
    %352 = vector.shape_cast %349 : vector<2x32xf32> to vector<1x1x2x32xf32>
    tpu.vector_store %arg12[%c1_167, %c5_168, %c0_169, %c0_170], %352 {strides = array<i32>} : memref<2x8x2x32xf32, #tpu.memory_space<vmem>>, vector<1x1x2x32xf32>,
    %c1_171 = arith.constant 1 : index
    %c5_172 = arith.constant 5 : index
    %c0_173 = arith.constant 0 : index
    %c0_174 = arith.constant 0 : index
    %353 = vector.load %arg13[%c1_171, %c5_172, %c0_173, %c0_174] : memref<2x8x2x32xf32, #tpu.memory_space<vmem>>, vector<1x1x2x32xf32>
    %354 = vector.shape_cast %353 : vector<1x1x2x32xf32> to vector<2x32xf32>
    %355 = vector.shape_cast %347 : vector<2x32xf32> to vector<1x1x2x32xf32>
    tpu.vector_store %arg13[%c1_171, %c5_172, %c0_173, %c0_174], %355 {strides = array<i32>} : memref<2x8x2x32xf32, #tpu.memory_space<vmem>>, vector<1x1x2x32xf32>,
    %cst_175 = arith.constant dense<0.000000e+00> : vector<2x128xf32>
    %356 = tpu.matmul %321, %2, %cst_175 {dimension_numbers = #tpu.dot_dimension_numbers<[1], [0], [0], [1], [0, 0, 1, 1], [], []>} : vector<2x32xf32>, vector<32x128xf32>, vector<2x128xf32> -> vector<2x128xf32>
    %357 = arith.addf %27, %356 : vector<2x128xf32>
    %cst_176 = arith.constant 5.000000e-01 : f32
    %358 = vector.broadcast %cst_176 : f32 to vector<2x128xf32>
    %359 = arith.mulf %358, %357 : vector<2x128xf32>
    %360 = math.tanh %359 : vector<2x128xf32>
    %cst_177 = arith.constant 1.000000e+00 : f32
    %361 = vector.broadcast %cst_177 : f32 to vector<2x128xf32>
    %362 = arith.addf %360, %361 : vector<2x128xf32>
    %cst_178 = arith.constant 5.000000e-01 : f32
    %363 = vector.broadcast %cst_178 : f32 to vector<2x128xf32>
    %364 = arith.mulf %363, %362 : vector<2x128xf32>
    %365 = vector.extract_strided_slice %357 {offsets = [0, 96], sizes = [2, 32], strides = [1, 1]} : vector<2x128xf32> to vector<2x32xf32>
    %366 = math.tanh %365 : vector<2x32xf32>
    %367 = vector.extract_strided_slice %364 {offsets = [0, 0], sizes = [2, 32], strides = [1, 1]} : vector<2x128xf32> to vector<2x32xf32>
    %368 = vector.extract_strided_slice %364 {offsets = [0, 32], sizes = [2, 32], strides = [1, 1]} : vector<2x128xf32> to vector<2x32xf32>
    %369 = vector.extract_strided_slice %364 {offsets = [0, 64], sizes = [2, 32], strides = [1, 1]} : vector<2x128xf32> to vector<2x32xf32>
    %370 = arith.mulf %368, %319 : vector<2x32xf32>
    %371 = arith.mulf %367, %366 : vector<2x32xf32>
    %372 = arith.addf %370, %371 : vector<2x32xf32>
    %373 = math.tanh %372 : vector<2x32xf32>
    %374 = arith.mulf %369, %373 : vector<2x32xf32>
    %c0_179 = arith.constant 0 : index
    %c6 = arith.constant 6 : index
    %c0_180 = arith.constant 0 : index
    %c0_181 = arith.constant 0 : index
    %375 = vector.load %arg12[%c0_179, %c6, %c0_180, %c0_181] : memref<2x8x2x32xf32, #tpu.memory_space<vmem>>, vector<1x1x2x32xf32>
    %376 = vector.shape_cast %375 : vector<1x1x2x32xf32> to vector<2x32xf32>
    %377 = vector.shape_cast %374 : vector<2x32xf32> to vector<1x1x2x32xf32>
    tpu.vector_store %arg12[%c0_179, %c6, %c0_180, %c0_181], %377 {strides = array<i32>} : memref<2x8x2x32xf32, #tpu.memory_space<vmem>>, vector<1x1x2x32xf32>,
    %c0_182 = arith.constant 0 : index
    %c6_183 = arith.constant 6 : index
    %c0_184 = arith.constant 0 : index
    %c0_185 = arith.constant 0 : index
    %378 = vector.load %arg13[%c0_182, %c6_183, %c0_184, %c0_185] : memref<2x8x2x32xf32, #tpu.memory_space<vmem>>, vector<1x1x2x32xf32>
    %379 = vector.shape_cast %378 : vector<1x1x2x32xf32> to vector<2x32xf32>
    %380 = vector.shape_cast %372 : vector<2x32xf32> to vector<1x1x2x32xf32>
    tpu.vector_store %arg13[%c0_182, %c6_183, %c0_184, %c0_185], %380 {strides = array<i32>} : memref<2x8x2x32xf32, #tpu.memory_space<vmem>>, vector<1x1x2x32xf32>,
    %cst_186 = arith.constant dense<0.000000e+00> : vector<2x128xf32>
    %381 = tpu.matmul %374, %1, %cst_186 {dimension_numbers = #tpu.dot_dimension_numbers<[1], [0], [0], [1], [0, 0, 1, 1], [], []>} : vector<2x32xf32>, vector<32x128xf32>, vector<2x128xf32> -> vector<2x128xf32>
    %cst_187 = arith.constant dense<0.000000e+00> : vector<2x128xf32>
    %382 = tpu.matmul %349, %3, %cst_187 {dimension_numbers = #tpu.dot_dimension_numbers<[1], [0], [0], [1], [0, 0, 1, 1], [], []>} : vector<2x32xf32>, vector<32x128xf32>, vector<2x128xf32> -> vector<2x128xf32>
    %383 = arith.addf %381, %382 : vector<2x128xf32>
    %384 = vector.broadcast %5 : vector<1x128xf32> to vector<2x128xf32>
    %385 = arith.addf %383, %384 : vector<2x128xf32>
    %cst_188 = arith.constant 5.000000e-01 : f32
    %386 = vector.broadcast %cst_188 : f32 to vector<2x128xf32>
    %387 = arith.mulf %386, %385 : vector<2x128xf32>
    %388 = math.tanh %387 : vector<2x128xf32>
    %cst_189 = arith.constant 1.000000e+00 : f32
    %389 = vector.broadcast %cst_189 : f32 to vector<2x128xf32>
    %390 = arith.addf %388, %389 : vector<2x128xf32>
    %cst_190 = arith.constant 5.000000e-01 : f32
    %391 = vector.broadcast %cst_190 : f32 to vector<2x128xf32>
    %392 = arith.mulf %391, %390 : vector<2x128xf32>
    %393 = vector.extract_strided_slice %385 {offsets = [0, 96], sizes = [2, 32], strides = [1, 1]} : vector<2x128xf32> to vector<2x32xf32>
    %394 = math.tanh %393 : vector<2x32xf32>
    %395 = vector.extract_strided_slice %392 {offsets = [0, 0], sizes = [2, 32], strides = [1, 1]} : vector<2x128xf32> to vector<2x32xf32>
    %396 = vector.extract_strided_slice %392 {offsets = [0, 32], sizes = [2, 32], strides = [1, 1]} : vector<2x128xf32> to vector<2x32xf32>
    %397 = vector.extract_strided_slice %392 {offsets = [0, 64], sizes = [2, 32], strides = [1, 1]} : vector<2x128xf32> to vector<2x32xf32>
    %398 = arith.mulf %396, %347 : vector<2x32xf32>
    %399 = arith.mulf %395, %394 : vector<2x32xf32>
    %400 = arith.addf %398, %399 : vector<2x32xf32>
    %401 = math.tanh %400 : vector<2x32xf32>
    %402 = arith.mulf %397, %401 : vector<2x32xf32>
    %c1_191 = arith.constant 1 : index
    %c6_192 = arith.constant 6 : index
    %c0_193 = arith.constant 0 : index
    %c0_194 = arith.constant 0 : index
    %403 = vector.load %arg12[%c1_191, %c6_192, %c0_193, %c0_194] : memref<2x8x2x32xf32, #tpu.memory_space<vmem>>, vector<1x1x2x32xf32>
    %404 = vector.shape_cast %403 : vector<1x1x2x32xf32> to vector<2x32xf32>
    %405 = vector.shape_cast %402 : vector<2x32xf32> to vector<1x1x2x32xf32>
    tpu.vector_store %arg12[%c1_191, %c6_192, %c0_193, %c0_194], %405 {strides = array<i32>} : memref<2x8x2x32xf32, #tpu.memory_space<vmem>>, vector<1x1x2x32xf32>,
    %c1_195 = arith.constant 1 : index
    %c6_196 = arith.constant 6 : index
    %c0_197 = arith.constant 0 : index
    %c0_198 = arith.constant 0 : index
    %406 = vector.load %arg13[%c1_195, %c6_196, %c0_197, %c0_198] : memref<2x8x2x32xf32, #tpu.memory_space<vmem>>, vector<1x1x2x32xf32>
    %407 = vector.shape_cast %406 : vector<1x1x2x32xf32> to vector<2x32xf32>
    %408 = vector.shape_cast %400 : vector<2x32xf32> to vector<1x1x2x32xf32>
    tpu.vector_store %arg13[%c1_195, %c6_196, %c0_197, %c0_198], %408 {strides = array<i32>} : memref<2x8x2x32xf32, #tpu.memory_space<vmem>>, vector<1x1x2x32xf32>,
    %cst_199 = arith.constant dense<0.000000e+00> : vector<2x128xf32>
    %409 = tpu.matmul %374, %2, %cst_199 {dimension_numbers = #tpu.dot_dimension_numbers<[1], [0], [0], [1], [0, 0, 1, 1], [], []>} : vector<2x32xf32>, vector<32x128xf32>, vector<2x128xf32> -> vector<2x128xf32>
    %410 = arith.addf %29, %409 : vector<2x128xf32>
    %cst_200 = arith.constant 5.000000e-01 : f32
    %411 = vector.broadcast %cst_200 : f32 to vector<2x128xf32>
    %412 = arith.mulf %411, %410 : vector<2x128xf32>
    %413 = math.tanh %412 : vector<2x128xf32>
    %cst_201 = arith.constant 1.000000e+00 : f32
    %414 = vector.broadcast %cst_201 : f32 to vector<2x128xf32>
    %415 = arith.addf %413, %414 : vector<2x128xf32>
    %cst_202 = arith.constant 5.000000e-01 : f32
    %416 = vector.broadcast %cst_202 : f32 to vector<2x128xf32>
    %417 = arith.mulf %416, %415 : vector<2x128xf32>
    %418 = vector.extract_strided_slice %410 {offsets = [0, 96], sizes = [2, 32], strides = [1, 1]} : vector<2x128xf32> to vector<2x32xf32>
    %419 = math.tanh %418 : vector<2x32xf32>
    %420 = vector.extract_strided_slice %417 {offsets = [0, 0], sizes = [2, 32], strides = [1, 1]} : vector<2x128xf32> to vector<2x32xf32>
    %421 = vector.extract_strided_slice %417 {offsets = [0, 32], sizes = [2, 32], strides = [1, 1]} : vector<2x128xf32> to vector<2x32xf32>
    %422 = vector.extract_strided_slice %417 {offsets = [0, 64], sizes = [2, 32], strides = [1, 1]} : vector<2x128xf32> to vector<2x32xf32>
    %423 = arith.mulf %421, %372 : vector<2x32xf32>
    %424 = arith.mulf %420, %419 : vector<2x32xf32>
    %425 = arith.addf %423, %424 : vector<2x32xf32>
    %426 = math.tanh %425 : vector<2x32xf32>
    %427 = arith.mulf %422, %426 : vector<2x32xf32>
    %c0_203 = arith.constant 0 : index
    %c7 = arith.constant 7 : index
    %c0_204 = arith.constant 0 : index
    %c0_205 = arith.constant 0 : index
    %428 = vector.load %arg12[%c0_203, %c7, %c0_204, %c0_205] : memref<2x8x2x32xf32, #tpu.memory_space<vmem>>, vector<1x1x2x32xf32>
    %429 = vector.shape_cast %428 : vector<1x1x2x32xf32> to vector<2x32xf32>
    %430 = vector.shape_cast %427 : vector<2x32xf32> to vector<1x1x2x32xf32>
    tpu.vector_store %arg12[%c0_203, %c7, %c0_204, %c0_205], %430 {strides = array<i32>} : memref<2x8x2x32xf32, #tpu.memory_space<vmem>>, vector<1x1x2x32xf32>,
    %c0_206 = arith.constant 0 : index
    %c7_207 = arith.constant 7 : index
    %c0_208 = arith.constant 0 : index
    %c0_209 = arith.constant 0 : index
    %431 = vector.load %arg13[%c0_206, %c7_207, %c0_208, %c0_209] : memref<2x8x2x32xf32, #tpu.memory_space<vmem>>, vector<1x1x2x32xf32>
    %432 = vector.shape_cast %431 : vector<1x1x2x32xf32> to vector<2x32xf32>
    %433 = vector.shape_cast %425 : vector<2x32xf32> to vector<1x1x2x32xf32>
    tpu.vector_store %arg13[%c0_206, %c7_207, %c0_208, %c0_209], %433 {strides = array<i32>} : memref<2x8x2x32xf32, #tpu.memory_space<vmem>>, vector<1x1x2x32xf32>,
    %cst_210 = arith.constant dense<0.000000e+00> : vector<2x128xf32>
    %434 = tpu.matmul %427, %1, %cst_210 {dimension_numbers = #tpu.dot_dimension_numbers<[1], [0], [0], [1], [0, 0, 1, 1], [], []>} : vector<2x32xf32>, vector<32x128xf32>, vector<2x128xf32> -> vector<2x128xf32>
    %cst_211 = arith.constant dense<0.000000e+00> : vector<2x128xf32>
    %435 = tpu.matmul %402, %3, %cst_211 {dimension_numbers = #tpu.dot_dimension_numbers<[1], [0], [0], [1], [0, 0, 1, 1], [], []>} : vector<2x32xf32>, vector<32x128xf32>, vector<2x128xf32> -> vector<2x128xf32>
    %436 = arith.addf %434, %435 : vector<2x128xf32>
    %437 = vector.broadcast %5 : vector<1x128xf32> to vector<2x128xf32>
    %438 = arith.addf %436, %437 : vector<2x128xf32>
    %cst_212 = arith.constant 5.000000e-01 : f32
    %439 = vector.broadcast %cst_212 : f32 to vector<2x128xf32>
    %440 = arith.mulf %439, %438 : vector<2x128xf32>
    %441 = math.tanh %440 : vector<2x128xf32>
    %cst_213 = arith.constant 1.000000e+00 : f32
    %442 = vector.broadcast %cst_213 : f32 to vector<2x128xf32>
    %443 = arith.addf %441, %442 : vector<2x128xf32>
    %cst_214 = arith.constant 5.000000e-01 : f32
    %444 = vector.broadcast %cst_214 : f32 to vector<2x128xf32>
    %445 = arith.mulf %444, %443 : vector<2x128xf32>
    %446 = vector.extract_strided_slice %438 {offsets = [0, 96], sizes = [2, 32], strides = [1, 1]} : vector<2x128xf32> to vector<2x32xf32>
    %447 = math.tanh %446 : vector<2x32xf32>
    %448 = vector.extract_strided_slice %445 {offsets = [0, 0], sizes = [2, 32], strides = [1, 1]} : vector<2x128xf32> to vector<2x32xf32>
    %449 = vector.extract_strided_slice %445 {offsets = [0, 32], sizes = [2, 32], strides = [1, 1]} : vector<2x128xf32> to vector<2x32xf32>
    %450 = vector.extract_strided_slice %445 {offsets = [0, 64], sizes = [2, 32], strides = [1, 1]} : vector<2x128xf32> to vector<2x32xf32>
    %451 = arith.mulf %449, %400 : vector<2x32xf32>
    %452 = arith.mulf %448, %447 : vector<2x32xf32>
    %453 = arith.addf %451, %452 : vector<2x32xf32>
    %454 = math.tanh %453 : vector<2x32xf32>
    %455 = arith.mulf %450, %454 : vector<2x32xf32>
    %c1_215 = arith.constant 1 : index
    %c7_216 = arith.constant 7 : index
    %c0_217 = arith.constant 0 : index
    %c0_218 = arith.constant 0 : index
    %456 = vector.load %arg12[%c1_215, %c7_216, %c0_217, %c0_218] : memref<2x8x2x32xf32, #tpu.memory_space<vmem>>, vector<1x1x2x32xf32>
    %457 = vector.shape_cast %456 : vector<1x1x2x32xf32> to vector<2x32xf32>
    %458 = vector.shape_cast %455 : vector<2x32xf32> to vector<1x1x2x32xf32>
    tpu.vector_store %arg12[%c1_215, %c7_216, %c0_217, %c0_218], %458 {strides = array<i32>} : memref<2x8x2x32xf32, #tpu.memory_space<vmem>>, vector<1x1x2x32xf32>,
    %c1_219 = arith.constant 1 : index
    %c7_220 = arith.constant 7 : index
    %c0_221 = arith.constant 0 : index
    %c0_222 = arith.constant 0 : index
    %459 = vector.load %arg13[%c1_219, %c7_220, %c0_221, %c0_222] : memref<2x8x2x32xf32, #tpu.memory_space<vmem>>, vector<1x1x2x32xf32>
    %460 = vector.shape_cast %459 : vector<1x1x2x32xf32> to vector<2x32xf32>
    %461 = vector.shape_cast %453 : vector<2x32xf32> to vector<1x1x2x32xf32>
    tpu.vector_store %arg13[%c1_219, %c7_220, %c0_221, %c0_222], %461 {strides = array<i32>} : memref<2x8x2x32xf32, #tpu.memory_space<vmem>>, vector<1x1x2x32xf32>,
    %462 = vector.shape_cast %427 : vector<2x32xf32> to vector<1x2x32xf32>
    %463 = vector.shape_cast %455 : vector<2x32xf32> to vector<1x2x32xf32>
    %464 = tpu.concatenate %462, %463 in 0 : vector<1x2x32xf32>, vector<1x2x32xf32> -> vector<2x2x32xf32>
    %c0_223 = arith.constant 0 : index
    %c0_224 = arith.constant 0 : index
    %c0_225 = arith.constant 0 : index
    %465 = vector.load %arg14[%c0_223, %c0_224, %c0_225] : memref<2x2x32xf32, #tpu.memory_space<vmem>>, vector<2x2x32xf32>
    tpu.vector_store %arg14[%c0_223, %c0_224, %c0_225], %464 {strides = array<i32>} : memref<2x2x32xf32, #tpu.memory_space<vmem>>, vector<2x2x32xf32>,
    %466 = vector.shape_cast %425 : vector<2x32xf32> to vector<1x2x32xf32>
    %467 = vector.shape_cast %453 : vector<2x32xf32> to vector<1x2x32xf32>
    %468 = tpu.concatenate %466, %467 in 0 : vector<1x2x32xf32>, vector<1x2x32xf32> -> vector<2x2x32xf32>
    %c0_226 = arith.constant 0 : index
    %c0_227 = arith.constant 0 : index
    %c0_228 = arith.constant 0 : index
    %469 = vector.load %arg15[%c0_226, %c0_227, %c0_228] : memref<2x2x32xf32, #tpu.memory_space<vmem>>, vector<2x2x32xf32>
    tpu.vector_store %arg15[%c0_226, %c0_227, %c0_228], %468 {strides = array<i32>} : memref<2x2x32xf32, #tpu.memory_space<vmem>>, vector<2x2x32xf32>,
    %470 = vector.shape_cast %84 : vector<2x32xf32> to vector<2x1x32xf32>
    %471 = vector.shape_cast %137 : vector<2x32xf32> to vector<2x1x32xf32>
    %472 = vector.shape_cast %190 : vector<2x32xf32> to vector<2x1x32xf32>
    %473 = vector.shape_cast %243 : vector<2x32xf32> to vector<2x1x32xf32>
    %474 = vector.shape_cast %296 : vector<2x32xf32> to vector<2x1x32xf32>
    %475 = vector.shape_cast %349 : vector<2x32xf32> to vector<2x1x32xf32>
    %476 = vector.shape_cast %402 : vector<2x32xf32> to vector<2x1x32xf32>
    %477 = vector.shape_cast %455 : vector<2x32xf32> to vector<2x1x32xf32>
    %478 = tpu.concatenate %470, %471, %472, %473, %474, %475, %476, %477 in 1 : vector<2x1x32xf32>, vector<2x1x32xf32>, vector<2x1x32xf32>, vector<2x1x32xf32>, vector<2x1x32xf32>, vector<2x1x32xf32>, vector<2x1x32xf32>, vector<2x1x32xf32> -> vector<2x8x32xf32>
    %479 = vector.shape_cast %478 : vector<2x8x32xf32> to vector<16x32xf32>
    %cst_229 = arith.constant dense<0.000000e+00> : vector<16x8xf32>
    %480 = tpu.matmul %479, %6, %cst_229 {dimension_numbers = #tpu.dot_dimension_numbers<[1], [0], [0], [1], [0, 0, 1, 1], [], []>} : vector<16x32xf32>, vector<32x8xf32>, vector<16x8xf32> -> vector<16x8xf32>
    %481 = vector.broadcast %7 : vector<1x8xf32> to vector<16x8xf32>
    %482 = arith.addf %480, %481 : vector<16x8xf32>
    %483 = vector.shape_cast %482 : vector<16x8xf32> to vector<2x8x8xf32>
    %c0_230 = arith.constant 0 : index
    %c0_231 = arith.constant 0 : index
    %c0_232 = arith.constant 0 : index
    %484 = vector.load %arg11[%c0_230, %c0_231, %c0_232] : memref<2x8x8xf32, #tpu.memory_space<vmem>>, vector<2x8x8xf32>
    tpu.vector_store %arg11[%c0_230, %c0_231, %c0_232], %483 {strides = array<i32>} : memref<2x8x8xf32, #tpu.memory_space<vmem>>, vector<2x8x8xf32>,
    return
  }
}

</mosaic_0001>

<bundles_post_ra>
// kernel: tpu_custom_call.1
= control target key start
LH: loop header
LB: loop body
LE: loop exit
PB: predicated region body
PF: predicated region fallthrough
CT: control target
= control target key end

     0   :  { %21 = vsyncpa [#allocation3], 0  ;;  %s3094_s0 = inlined_call_operand.hbm [shape: f32[2,8,16], index: 0, kind: input, shape index: {}]   ;;  %s3095_s1 = inlined_call_operand.vmem [shape: f32[2,2,32], index: 1, kind: input, shape index: {}]   ;;  %s3096_s2 = inlined_call_operand.vmem [shape: f32[2,2,32], index: 2, kind: input, shape index: {}]   ;;  %s3097_s3 = inlined_call_operand.hbm [shape: f32[16,128], index: 3, kind: input, shape index: {}]   ;;  %s3098_s4 = inlined_call_operand.vmem [shape: f32[32,128], index: 4, kind: input, shape index: {}]   ;;  %s3099_s5 = inlined_call_operand.hbm [shape: f32[32,128], index: 5, kind: input, shape index: {}]   ;;  %s3100_s6 = inlined_call_operand.hbm [shape: f32[32,128], index: 6, kind: input, shape index: {}]   ;;  %s3101_s7 = inlined_call_operand.hbm [shape: f32[1,128], index: 7, kind: input, shape index: {}]   ;;  %s3102_s8 = inlined_call_operand.hbm [shape: f32[1,128], index: 8, kind: input, shape index: {}]   ;;  %s3103_s9 = inlined_call_operand.vmem [shape: f32[32,8], index: 9, kind: input, shape index: {}]   ;;  %s3104_s10 = inlined_call_operand.vmem [shape: f32[1,8], index: 10, kind: input, shape index: {}]   ;;  %s3105_s11 = inlined_call_operand.hbm [shape: f32[2,8,8], index: 11, kind: output, shape index: {0}]   ;;  %s3106_s12 = inlined_call_operand.hbm [shape: f32[2,8,2,32], index: 12, kind: output, shape index: {1}]   ;;  %s3107_s13 = inlined_call_operand.hbm [shape: f32[2,8,2,32], index: 13, kind: output, shape index: {2}]   ;;  %s3108_s14 = inlined_call_operand.hbm [shape: f32[2,2,32], index: 14, kind: output, shape index: {3}]   ;;  %s3109_s15 = inlined_call_operand.hbm [shape: f32[2,2,32], index: 15, kind: output, shape index: {4}]  }
   0x1   :  { %22 = vsyncpa [#allocation6], 0 }
   0x2   :  { %23 = vsyncpa [#allocation9], 0 }
   0x3   :  { %24 = vsyncpa [#allocation12], 0 }
   0x4   :  { %25 = vsyncpa [#allocation4], 0 }
   0x5   :  { %26 = vsyncpa [#allocation15], 0 }
   0x6   :  { %27 = vsyncpa [#allocation18], 0  ;;  %s49_s20 = sshll.u32 %s3097_s3, 4  ;;  %s2327_s21 = smov [#allocation5]   ;;  %s50_s20 = int_to_ptr.hbm [resolvable:$true] %s49_s20 }
   0x7   :  { %s51_s22 = sshll.u32 %s2327_s21, 4  ;;  %s77_s25 = sshll.u32 %s3100_s6, 4  ;;  %s52_s22 = int_to_ptr.vmem [resolvable:$true] %s51_s22  ;;  %s78_s25 = int_to_ptr.hbm [resolvable:$true] %s77_s25 }
   0x8   :  { %s2328_s26 = smov 128   ;;  %s2329_s27 = smov 8  }
   0x9   :  { %57 = dma.hbm_to_vmem [thread:$0]  %s50_s20, 256, %s52_s22, [#allocation6], %s2328_s26, %s2328_s26, %s2329_s27  }
   0xa   :  { %s2330_s28 = smov [#allocation8]   ;;  %s32_s3 = sshll.u32 %s3094_s0, 4  ;;  %s33_s3 = int_to_ptr.hbm [resolvable:$true] %s32_s3 }
   0xb   :  { %s79_s29 = sshll.u32 %s2330_s28, 4  ;;  %s64_s18 = sshll.u32 %s3099_s5, 4  ;;  %s80_s29 = int_to_ptr.vmem [resolvable:$true] %s79_s29  ;;  %s65_s18 = int_to_ptr.hbm [resolvable:$true] %s64_s18 }
   0xc   :  { %85 = dma.hbm_to_vmem [thread:$0]  %s78_s25, 512, %s80_s29, [#allocation9], %s2328_s26, %s2328_s26, %s2329_s27  }
   0xd   :  { %s2331_s19 = smov [#allocation2]   ;;  %s2332_s20 = smov [#allocation7]  }
   0xe   :  { %s34_s21 = sshll.u32 %s2331_s19, 4  ;;  %s66_s0 = sshll.u32 %s2332_s20, 4  ;;  %s35_s21 = int_to_ptr.vmem [resolvable:$true] %s34_s21  ;;  %s67_s0 = int_to_ptr.vmem [resolvable:$true] %s66_s0 }
   0xf   :  { %40 = dma.hbm_to_vmem [thread:$0]  %s33_s3, 256, %s35_s21, [#allocation3], %s2328_s26, %s2328_s26, %s2329_s27  }
  0x10   :  { %s91_s24 = sshll.u32 %s3101_s7, 4  ;;  %s102_s28 = sshll.u32 %s3102_s8, 4  ;;  %s92_s24 = int_to_ptr.hbm [resolvable:$true] %s91_s24  ;;  %s103_s28 = int_to_ptr.hbm [resolvable:$true] %s102_s28 }
  0x11   :  { %72 = dma.hbm_to_vmem [thread:$0]  %s65_s18, 512, %s67_s0, [#allocation6], %s2328_s26, %s2328_s26, %s2329_s27  }
  0x12   :  { %s2333_s29 = smov [#allocation10]   ;;  %s2334_s16 = smov [#allocation11]  }
  0x13   :  { %s93_s30 = sshll.u32 %s2333_s29, 4  ;;  %s104_s3 = sshll.u32 %s2334_s16, 4  ;;  %s94_s30 = int_to_ptr.vmem [resolvable:$true] %s93_s30  ;;  %s105_s3 = int_to_ptr.vmem [resolvable:$true] %s104_s3 }
  0x14   :  { %96 = dma.hbm_to_vmem [thread:$0]  %s92_s24, 16, %s94_s30, [#allocation9]  }
  0x15   :  { %107 = dma.hbm_to_vmem [thread:$0]  %s103_s28, 16, %s105_s3, [#allocation12]  }
  0x16   :  { %2313 = dma.done.wait [#allocation3], 256  }
  0x17   :  { %2314 = vsyncadd [#allocation3], 4294967040 }
  0x18   :  { %2315 = dma.done.wait [#allocation6], 768  }
  0x19   :  { %2316 = vsyncadd [#allocation6], 4294966528 }
  0x1a   :  { %2317 = dma.done.wait [#allocation9], 528  }
  0x1b   :  { %2318 = vsyncadd [#allocation9], 4294966768 }
  0x1c   :  { %2319 = dma.done.wait [#allocation12], 16  }
  0x1d   :  { %2320 = vsyncadd [#allocation12], 4294967280  ;;  %v137_v0 = vld [vmem:[#allocation5 + $0x8] sm:$0xff]  ;;  %v136_v2 = vld [vmem:[#allocation5] sm:$0xff]  ;;  %vm162_vm0 = vcmask 130048   ;;  %vm198_vm1 = vcmask 261120  }
  0x1e   :  { %v2454_v1 = vld [vmem:[#allocation7 + $0x18] sm:$0xff]  ;;  %183 = vmatpush.msra.mxu0 %v137_v0  ;;  %v2457_v3 = vld [vmem:[#allocation7 + $0x10] sm:$0xff]  ;;  %v157_v4 = vld [vmem:[#allocation2] sm:$0xff]  ;;  %s2335_s18 = smov 32   ;;  %vm283_vm2 = vcmask 1041409   ;;  %vm288_vm3 = vcmask 254976  }
  0x1f   :  { %214 = vmatpush.msra.mxu1 %v2454_v1  ;;  %v2459_v5 = vld [vmem:[#allocation7 + $0x8] sm:$0xff]  ;;  %v195_v6 = vld [vmem:[%s3096_s2] sm:$0x3]  ;;  %v2507_v44 = vld [vmem:[#allocation8 + $0x18] sm:$0xff]  ;;  %vm461_vm4 = vcmask 1042434   ;;  %vm638_vm5 = vcmask 1043459  }
  0x20   :  { %184 = vmatpush.msra.mxu0 %v136_v2  ;;  %v2466_v7 = vld [vmem:[#allocation7] sm:$0xff]  ;;  %v239_v8 = vrot.slane %v195_v6, 1  ;;  %v158_v10 = vld [vmem:[#allocation2 + $0x8] sm:$0xff]  ;;  %v2509_v45 = vld [vmem:[#allocation8 + $0x10] sm:$0xff]  ;;  %313 = vmatpush.msra.mxu3 %v2507_v44  ;;  %vm1697_vm6 = vcmask 1040384   ;;  %vm1700_vm7 = vcmask 1041408  }
  0x21   :  { %215 = vmatpush.msra.mxu1 %v2457_v3  ;;  %1849 = vmatmul.msk.f32.vlgmr.msra.gmra.mxu0 %vm162_vm0, %v157_v4  ;;  %v192_v9 = vld [vmem:[%s3095_s1] sm:$0x3]  ;;  %v2513_v46 = vld [vmem:[#allocation8 + $0x8] sm:$0xff]  ;;  %v1851_v48 = vld [vmem:[%s3095_s1 + $0x2] sm:$0x3]  ;;  %vm994_vm8 = vcmask 1045509  }
  0x22   :  { %573 = vmatpush.msrb.mxu0 %v2454_v1  ;;  %242 = vrot.lane.b32.xlu1 %v239_v8, %s2335_s18  ;;  %v1898_v13 = vld [vmem:[#allocation10] ss:$0 sm:$0xff]  ;;  %v2531_v49 = vld [vmem:[%s3098_s4 + $0x18] sm:$0xff]  ;;  %v2541_v50 = vld [vmem:[%s3098_s4 + $0x10] sm:$0xff]  ;;  %vm1703_vm9 = vcmask 1042432   ;;  %vm1706_vm10 = vcmask 1043456  }
  0x23   :  { %216 = vmatpush.msra.mxu1 %v2459_v5  ;;  %492 = vmatpush.msra.mxu2 %v2507_v44  ;;  %v2519_v47 = vld [vmem:[#allocation8] sm:$0xff]  ;;  %v2549_v51 = vld [vmem:[%s3098_s4 + $0x8] sm:$0xff]  ;;  %vm1172_vm11 = vcmask 1046534   ;;  %vm1709_vm12 = vcmask 1044480   ;;  %vm1712_vm13 = vcmask 1045504   ;;  %vm816_vm14 = vcmask 1044484  }
  0x24   :  { %574 = vmatpush.msrb.mxu0 %v2457_v3  ;;  %314 = vmatpush.msra.mxu3 %v2509_v45  ;;  %v2557_v52 = vld [vmem:[%s3098_s4] sm:$0xff]  ;;  %s2336_s4 = smov 64   ;;  %vm1715_vm15 = vcmask 1046528   ;;  %s1776_s22 = sshll.u32 %s3106_s12, 4  ;;  %s1777_s22 = int_to_ptr.hbm [resolvable:$true] %s1776_s22 }
  0x25   :  { %217 = vmatpush.msra.mxu1 %v2466_v7  ;;  %493 = vmatpush.msra.mxu2 %v2509_v45  ;;  %v2583_v2 = vld [vmem:[#allocation11] ss:$0 sm:$0xff]  ;;  %s2339_s23 = smov [#allocation17]   ;;  %s1802_s25 = sshll.u32 %s3108_s14, 4  ;;  %s1803_s25 = int_to_ptr.hbm [resolvable:$true] %s1802_s25 }
  0x26   :  { %1853 = vmatmul.msk.f32.vlgmr.msra.gmra.mxu1 %vm198_vm1, %v192_v9  ;;  %575 = vmatpush.msrb.mxu0 %v2459_v5  ;;  %s1800_s1 = sshll.u32 %s2339_s23, 4  ;;  %s2341_s12 = smov [#allocation16]   ;;  %s1801_s1 = int_to_ptr.vmem [resolvable:$true] %s1800_s1 }
  0x27   :  { %397 = vmatpush.msrb.mxu1 %v2454_v1  ;;  %315 = vmatpush.msra.mxu3 %v2513_v46  ;;  %s1787_s28 = sshll.u32 %s2341_s12, 4  ;;  %s2342_s30 = smov [#allocation19]   ;;  %s1788_s28 = int_to_ptr.vmem [resolvable:$true] %s1787_s28 }
  0x28   :  { %576 = vmatpush.msrb.mxu0 %v2466_v7  ;;  %494 = vmatpush.msra.mxu2 %v2513_v46  ;;  %s1813_s16 = sshll.u32 %s2342_s30, 4  ;;  %s1815_s7 = sshll.u32 %s3109_s15, 4  ;;  %s1814_s16 = int_to_ptr.vmem [resolvable:$true] %s1813_s16  ;;  %s1816_s7 = int_to_ptr.hbm [resolvable:$true] %s1815_s7 }
  0x29   :  { %398 = vmatpush.msrb.mxu1 %v2457_v3  ;;  %1850 = vmatmul.msk.f32.gmra.mxu0 %vm162_vm0, %v158_v10  ;;  %vm467_vm0 = vcmask 256001   ;;  %s2343_s15 = smov [#allocation13]  }
  0x2a   :  { %240 = vrot.lane.b32.xlu1 %v195_v6, %s2335_s18  ;;  %847 = vmatpush.msra.mxu0 %v2507_v44  ;;  %s1761_s17 = sshll.u32 %s2343_s15, 4  ;;  %s1762_s17 = int_to_ptr.vmem [resolvable:$true] %s1761_s17 }
  0x2b   :  { %399 = vmatpush.msrb.mxu1 %v2459_v5  ;;  %316 = vmatpush.msra.mxu3 %v2519_v47 }
  0x2c   :  { %848 = vmatpush.msra.mxu0 %v2509_v45  ;;  %495 = vmatpush.msra.mxu2 %v2519_v47 }
  0x2d   :  { %400 = vmatpush.msrb.mxu1 %v2466_v7  ;;  %1854 = vmatmul.msk.f32.vlgmr.msra.gmra.mxu3 %vm198_vm1, %v1851_v48 }
  0x2e   :  { %849 = vmatpush.msra.mxu0 %v2513_v46  ;;  %335 = vmatpush.msrb.mxu3 %v2531_v49 }
  0x2f   :  { %669 = vmatpush.msra.mxu1 %v2507_v44  ;;  %696 = vmatpush.msrb.mxu2 %v2531_v49 }
  0x30   :  { %850 = vmatpush.msra.mxu0 %v2519_v47  ;;  %336 = vmatpush.msrb.mxu3 %v2541_v50 }
  0x31   :  { %670 = vmatpush.msra.mxu1 %v2509_v45  ;;  %697 = vmatpush.msrb.mxu2 %v2541_v50 }
  0x32   :  { %337 = vmatpush.msrb.mxu3 %v2549_v51 }
  0x33   :  { %671 = vmatpush.msra.mxu1 %v2513_v46  ;;  %698 = vmatpush.msrb.mxu2 %v2549_v51 }
  0x34   :  { %338 = vmatpush.msrb.mxu3 %v2557_v52 }
  0x35   :  { %672 = vmatpush.msra.mxu1 %v2519_v47  ;;  %699 = vmatpush.msrb.mxu2 %v2557_v52 }
  0x36   :  { %518 = vmatpush.msra.mxu3 %v2531_v49 }
  0x38   :  { %519 = vmatpush.msra.mxu3 %v2541_v50 }
  0x3a   :  { %520 = vmatpush.msra.mxu3 %v2549_v51 }
  0x3c   :  { %521 = vmatpush.msra.mxu3 %v2557_v52 }
  0x94   :  { %v243_v34 = vpop.permute.xlu1 %242 }
  0x9c   :  { %v241_v38 = vpop.permute.xlu1 %240 }
  0x9e   :  { %v186_v11 = vpop.f32.mrf.mxu0 }
  0x9f   :  { %v2488_v18 = vadd.f32 %v1898_v13, %v186_v11 }
  0xa3   :  { %v219_v12 = vpop.f32.mrf.mxu1 }
  0xa4   :  { %v223_v14 = vrot.slane %v219_v12, 1  ;;  %v226_v19 = vadd.f32 %v219_v12, %v2488_v18  ;;  %v1852_v12 = vld [vmem:[%s3096_s2 + $0x2] sm:$0x3]  ;;  %s2337_s2 = smov 96  }
  0xa6   :  { %v189_v15 = vpop.f32.mrf.mxu0  ;;  %v228_v23 = vmul.f32 0.5, %v226_v19 }
  0xa7   :  { %v2485_v16 = vadd.f32 %v1898_v13, %v189_v15 }
  0xa9   :  { %v227_v17 = vadd.f32 %v223_v14, %v2485_v16 }
  0xab   :  { %1901 = vtanh.f32 %v227_v17  ;;  %v229_v22 = vmul.f32 0.5, %v227_v17 }
  0xac   :  { %1903 = vtanh.f32 %v226_v19 }
  0xad   :  { %1905 = vtanh.f32 %v229_v22 }
  0xae   :  { %1907 = vtanh.f32 %v228_v23 }
  0xb0   :  { %v318_v60 = vpop.f32.mrf.mxu3 }
  0xb1   :  { %v1902_v20 = vpop.eup %1901 }
  0xb2   :  { %252 = vrot.lane.b32.xlu0 %v1902_v20, %s2335_s18  ;;  %v1904_v21 = vpop.eup %1903 }
  0xb3   :  { %v1906_v24 = vpop.eup %1905 }
  0xb4   :  { %v233_v25 = vadd.f32 1.0, %v1906_v24  ;;  %v1908_v27 = vpop.eup %1907 }
  0xb5   :  { %v232_v30 = vadd.f32 1.0, %v1908_v27 }
  0xb6   :  { %v2493_v26 = vmul.f32 0.5, %v233_v25 }
  0xb7   :  { %v234_v31 = vmul.f32 0.5, %v232_v30 }
  0xb8   :  { %v247_v35 = vmul.f32 %v243_v34, %v2493_v26 }
  0xb9   :  { %v246_v39 = vmul.f32 %v241_v38, %v234_v31 }
  0xba   :  { %250 = vrot.lane.b32.xlu0 %v1904_v21, %s2335_s18 }
 0x124   :  { %v253_v28 = vpop.permute.xlu0 %252 }
 0x125   :  { %v257_v29 = vmul.f32 %v253_v28, %v2493_v26 }
 0x127   :  { %262 = vrot.lane.b32.xlu2 %v257_v29, %s2335_s18 }
 0x12c   :  { %v251_v32 = vpop.permute.xlu0 %250 }
 0x12d   :  { %v256_v33 = vmul.f32 %v251_v32, %v234_v31 }
 0x12f   :  { %260 = vrot.lane.b32.xlu2 %v256_v33, %s2335_s18 }
 0x181   :  { %v263_v36 = vpop.permute.xlu2 %262 }
 0x182   :  { %v2499_v37 = vadd.f32 %v263_v36, %v247_v35 }
 0x184   :  { %1909 = vtanh.f32 %v2499_v37  ;;  %v292_v33 = vrot.slane %v2499_v37, 7 }
 0x189   :  { %v261_v40 = vpop.permute.xlu2 %260 }
 0x18a   :  { %v1910_v41 = vpop.eup %1909  ;;  %v2502_v42 = vadd.f32 %v261_v40, %v246_v39 }
 0x18b   :  { %274 = vrot.lane.b32.xlu0 %v1910_v41, %s2335_s18 }
 0x18c   :  { %1911 = vtanh.f32 %v2502_v42  ;;  %v421_v36 = vrot.slane %v2502_v42, 7 }
 0x192   :  { %v1912_v43 = vpop.eup %1911 }
 0x193   :  { %272 = vrot.lane.b32.xlu1 %v1912_v43, %s2335_s18 }
 0x1fd   :  { %v275_v53 = vpop.permute.xlu0 %274 }
 0x1fe   :  { %v279_v54 = vmul.f32 %v275_v53, %v2493_v26 }
 0x200   :  { %v282_v56 = vrot.slane %v279_v54, 7 }
 0x205   :  { %v273_v55 = vpop.permute.xlu1 %272 }
 0x206   :  { %v278_v57 = vmul.f32 %v273_v55, %v234_v31 }
 0x208   :  { %v284_v58 = vsel %vm283_vm2, %v282_v56, %v278_v57 }
 0x209   :  { %285 = vrot.lane.b32.xlu2 %v284_v58, %s2336_s4 }
 0x263   :  { %v286_v59 = vpop.permute.xlu2 %285 }
 0x264   :  { %289 = vst.msk [vmem:[#allocation14] sm:$0x3] %vm288_vm3, %v286_v59  ;;  %1855 = vmatmul.msk.f32.vlgmr.msrb.gmra.mxu3 %vm198_vm1, %v286_v59  ;;  %1856 = vmatmul.msk.f32.vlgmr.msrb.gmra.mxu1 %vm198_vm1, %v286_v59 }
 0x265   :  { %751 = vmatpush.msrb.mxu3 %v2454_v1  ;;  %874 = vmatpush.msrb.mxu1 %v2531_v49 }
 0x267   :  { %752 = vmatpush.msrb.mxu3 %v2457_v3  ;;  %875 = vmatpush.msrb.mxu1 %v2541_v50 }
 0x269   :  { %753 = vmatpush.msrb.mxu3 %v2459_v5  ;;  %876 = vmatpush.msrb.mxu1 %v2549_v51 }
 0x26b   :  { %754 = vmatpush.msrb.mxu3 %v2466_v7  ;;  %877 = vmatpush.msrb.mxu1 %v2557_v52 }
 0x2e1   :  { %v402_v61 = vpop.f32.mrf.mxu1 }
 0x2e2   :  { %v406_v62 = vrot.slane %v402_v61, 7  ;;  %v410_v63 = vadd.f32 %v402_v61, %v2485_v16 }
 0x2e4   :  { %v409_v0 = vadd.f32 %v406_v62, %v2488_v18  ;;  %1913 = vtanh.f32 %v410_v63  ;;  %v412_v13 = vmul.f32 0.5, %v410_v63 }
 0x2e6   :  { %1915 = vtanh.f32 %v409_v0  ;;  %v411_v14 = vmul.f32 0.5, %v409_v0 }
 0x2e7   :  { %v340_v4 = vpop.f32.mrf.mxu3 }
 0x2e8   :  { %v341_v6 = vadd.f32 %v340_v4, %v318_v60 }
 0x2ea   :  { %v1914_v8 = vpop.eup %1913  ;;  %v346_v9 = vadd.f32 %v2583_v2, %v341_v6 }
 0x2eb   :  { %430 = vrot.lane.b32.xlu1 %v1914_v8, %s2335_s18 }
 0x2ec   :  { %1917 = vtanh.f32 %v346_v9  ;;  %v1916_v10 = vpop.eup %1915  ;;  %v347_v17 = vmul.f32 0.5, %v346_v9 }
 0x2ed   :  { %428 = vrot.lane.b32.xlu0 %v1916_v10, %s2335_s18  ;;  %1919 = vtanh.f32 %v412_v13 }
 0x2ee   :  { %1921 = vtanh.f32 %v411_v14 }
 0x2ef   :  { %1923 = vtanh.f32 %v347_v17 }
 0x2f2   :  { %v1918_v11 = vpop.eup %1917 }
 0x2f3   :  { %358 = vrot.lane.b32.xlu2 %v1918_v11, %s2335_s18  ;;  %v1920_v15 = vpop.eup %1919 }
 0x2f4   :  { %v1922_v19 = vpop.eup %1921  ;;  %v416_v20 = vadd.f32 1.0, %v1920_v15 }
 0x2f5   :  { %v415_v21 = vadd.f32 1.0, %v1922_v19  ;;  %v1924_v26 = vpop.eup %1923 }
 0x2f6   :  { %v418_v22 = vmul.f32 0.5, %v416_v20  ;;  %v349_v29 = vadd.f32 1.0, %v1924_v26 }
 0x2f7   :  { %v417_v25 = vmul.f32 0.5, %v415_v21 }
 0x2f8   :  { %v350_v31 = vmul.f32 0.5, %v349_v29  ;;  %v425_v34 = vmul.f32 %v418_v22, %v292_v33 }
 0x2f9   :  { %v424_v39 = vmul.f32 %v421_v36, %v417_v25 }
 0x2fb   :  { %353 = vrot.lane.b32.xlu2 %v1852_v12, %s2335_s18 }
 0x34d   :  { %v359_v30 = vpop.permute.xlu2 %358 }
 0x34e   :  { %v361_v32 = vmul.f32 %v359_v30, %v350_v31 }
 0x355   :  { %v354_v43 = vpop.permute.xlu2 %353 }
 0x356   :  { %v356_v53 = vmul.f32 %v354_v43, %v350_v31 }
 0x35d   :  { %v431_v23 = vpop.permute.xlu1 %430 }
 0x35e   :  { %v435_v24 = vmul.f32 %v431_v23, %v418_v22 }
 0x35f   :  { %v429_v27 = vpop.permute.xlu0 %428 }
 0x360   :  { %440 = vrot.lane.b32.xlu1 %v435_v24, %s2335_s18  ;;  %v434_v28 = vmul.f32 %v429_v27, %v417_v25 }
 0x362   :  { %438 = vrot.lane.b32.xlu0 %v434_v28, %s2335_s18 }
 0x36a   :  { %363 = vrot.lane.b32.xlu0 %v361_v32, %s2335_s18 }
 0x3d2   :  { %v441_v35 = vpop.permute.xlu1 %440 }
 0x3d3   :  { %v2600_v38 = vadd.f32 %v441_v35, %v425_v34 }
 0x3d4   :  { %v439_v40 = vpop.permute.xlu0 %438 }
 0x3d5   :  { %1925 = vtanh.f32 %v2600_v38  ;;  %v2603_v41 = vadd.f32 %v439_v40, %v424_v39 }
 0x3d7   :  { %1927 = vtanh.f32 %v2603_v41 }
 0x3db   :  { %v1926_v48 = vpop.eup %1925 }
 0x3dc   :  { %452 = vrot.lane.b32.xlu2 %v1926_v48, %s2335_s18  ;;  %v364_v54 = vpop.permute.xlu0 %363 }
 0x3dd   :  { %v1928_v55 = vpop.eup %1927  ;;  %v2607_v56 = vadd.f32 %v364_v54, %v356_v53 }
 0x3de   :  { %450 = vrot.lane.b32.xlu1 %v1928_v55, %s2335_s18 }
 0x3df   :  { %1929 = vtanh.f32 %v2607_v56 }
 0x3e5   :  { %v1930_v57 = vpop.eup %1929 }
 0x3e6   :  { %369 = vrot.lane.b32.xlu0 %v1930_v57, %s2335_s18 }
 0x436   :  { %v453_v58 = vpop.permute.xlu2 %452 }
 0x437   :  { %v457_v59 = vmul.f32 %v453_v58, %v418_v22 }
 0x439   :  { %v460_v61 = vrot.slane %v457_v59, 7 }
 0x450   :  { %v451_v60 = vpop.permute.xlu1 %450 }
 0x451   :  { %v456_v62 = vmul.f32 %v451_v60, %v417_v25 }
 0x453   :  { %v500_v63 = vrot.slane %v456_v62, 1  ;;  %v2613_v0 = vsel %vm461_vm4, %v460_v61, %v456_v62  ;;  %v598_v61 = vrot.slane %v2603_v41, 7  ;;  %v471_v62 = vrot.slane %v2600_v38, 7 }
 0x455   :  { %v501_v4 = vsel %vm283_vm2, %v457_v59, %v500_v63 }
 0x456   :  { %502 = vrot.lane.b32.xlu1 %v501_v4, %s2336_s4 }
 0x458   :  { %v370_v6 = vpop.permute.xlu0 %369 }
 0x459   :  { %v2617_v8 = vmul.f32 %v370_v6, %v350_v31 }
 0x45b   :  { %374 = vrot.lane.b32.xlu2 %v2617_v8, %s2336_s4 }
 0x4b5   :  { %v375_v9 = vpop.permute.xlu2 %374 }
 0x4b6   :  { %378 = vst.msk [vmem:[#allocation14 + $0x10] sm:$0x3] %vm288_vm3, %v375_v9  ;;  %1857 = vmatmul.msk.f32.vlgmr.msra.gmra.mxu2 %vm198_vm1, %v375_v9 }
 0x4b7   :  { %929 = vmatpush.msra.mxu2 %v2454_v1 }
 0x4b9   :  { %930 = vmatpush.msra.mxu2 %v2457_v3 }
 0x4bb   :  { %931 = vmatpush.msra.mxu2 %v2459_v5 }
 0x4bd   :  { %932 = vmatpush.msra.mxu2 %v2466_v7 }
 0x4c8   :  { %v503_v10 = vpop.permute.xlu1 %502 }
 0x4c9   :  { %1858 = vmatmul.msk.f32.vlgmr.msra.gmra.mxu3 %vm198_vm1, %v503_v10  ;;  %1859 = vmatmul.msk.f32.vlgmr.msrb.gmra.mxu0 %vm198_vm1, %v503_v10 }
 0x4ca   :  { %1025 = vmatpush.msra.mxu3 %v2507_v44  ;;  %1052 = vmatpush.msrb.mxu0 %v2531_v49 }
 0x4cc   :  { %1026 = vmatpush.msra.mxu3 %v2509_v45  ;;  %1053 = vmatpush.msrb.mxu0 %v2541_v50 }
 0x4ce   :  { %1027 = vmatpush.msra.mxu3 %v2513_v46  ;;  %1054 = vmatpush.msrb.mxu0 %v2549_v51 }
 0x4d0   :  { %1028 = vmatpush.msra.mxu3 %v2519_v47  ;;  %1055 = vmatpush.msrb.mxu0 %v2557_v52 }
 0x539   :  { %v497_v17 = vpop.f32.mrf.mxu2 }
 0x546   :  { %v578_v11 = vpop.f32.mrf.mxu0 }
 0x547   :  { %v582_v12 = vrot.slane %v578_v11, 6  ;;  %v583_v13 = vrot.slane %v578_v11, 7 }
 0x549   :  { %v586_v14 = vadd.f32 %v582_v12, %v2488_v18  ;;  %v587_v15 = vadd.f32 %v583_v13, %v2485_v16 }
 0x54b   :  { %1931 = vtanh.f32 %v586_v14  ;;  %v588_v29 = vmul.f32 0.5, %v586_v14  ;;  %v589_v31 = vmul.f32 0.5, %v587_v15 }
 0x54c   :  { %1933 = vtanh.f32 %v587_v15  ;;  %v523_v19 = vpop.f32.mrf.mxu3 }
 0x54d   :  { %v524_v20 = vadd.f32 %v523_v19, %v497_v17 }
 0x54f   :  { %v526_v21 = vadd.f32 %v2583_v2, %v524_v20 }
 0x551   :  { %v1932_v22 = vpop.eup %1931  ;;  %1935 = vtanh.f32 %v526_v21  ;;  %v527_v25 = vmul.f32 0.5, %v526_v21 }
 0x552   :  { %v1934_v23 = vpop.eup %1933  ;;  %605 = vrot.lane.b32.xlu0 %v1932_v22, %s2335_s18 }
 0x553   :  { %607 = vrot.lane.b32.xlu1 %v1934_v23, %s2335_s18  ;;  %1937 = vtanh.f32 %v527_v25 }
 0x554   :  { %1939 = vtanh.f32 %v588_v29 }
 0x555   :  { %1941 = vtanh.f32 %v589_v31 }
 0x557   :  { %v1936_v24 = vpop.eup %1935 }
 0x558   :  { %534 = vrot.lane.b32.xlu2 %v1936_v24, %s2335_s18 }
 0x559   :  { %v1938_v26 = vpop.eup %1937 }
 0x55a   :  { %v529_v27 = vadd.f32 1.0, %v1938_v26  ;;  %v1940_v34 = vpop.eup %1939 }
 0x55b   :  { %v1942_v35 = vpop.eup %1941  ;;  %v592_v36 = vadd.f32 1.0, %v1940_v34 }
 0x55c   :  { %v530_v28 = vmul.f32 0.5, %v529_v27  ;;  %v593_v39 = vadd.f32 1.0, %v1942_v35 }
 0x55d   :  { %v594_v40 = vmul.f32 0.5, %v592_v36 }
 0x55e   :  { %v595_v43 = vmul.f32 0.5, %v593_v39  ;;  %v532_v57 = vmul.f32 %v530_v28, %v2607_v56 }
 0x55f   :  { %v601_v63 = vmul.f32 %v598_v61, %v594_v40 }
 0x560   :  { %v602_v4 = vmul.f32 %v595_v43, %v471_v62 }
 0x5b2   :  { %v535_v30 = vpop.permute.xlu2 %534 }
 0x5b3   :  { %v537_v32 = vmul.f32 %v535_v30, %v530_v28 }
 0x5b5   :  { %539 = vrot.lane.b32.xlu2 %v537_v32, %s2335_s18 }
 0x5c4   :  { %v606_v48 = vpop.permute.xlu0 %605 }
 0x5c5   :  { %v608_v53 = vpop.permute.xlu1 %607  ;;  %v611_v54 = vmul.f32 %v606_v48, %v594_v40 }
 0x5c6   :  { %v612_v55 = vmul.f32 %v608_v53, %v595_v43 }
 0x5c7   :  { %615 = vrot.lane.b32.xlu0 %v611_v54, %s2335_s18 }
 0x5c8   :  { %617 = vrot.lane.b32.xlu1 %v612_v55, %s2335_s18 }
 0x60f   :  { %v540_v58 = vpop.permute.xlu2 %539 }
 0x610   :  { %v2647_v59 = vadd.f32 %v540_v58, %v532_v57 }
 0x612   :  { %1943 = vtanh.f32 %v2647_v59 }
 0x618   :  { %v1944_v60 = vpop.eup %1943 }
 0x619   :  { %545 = vrot.lane.b32.xlu2 %v1944_v60, %s2335_s18 }
 0x639   :  { %v616_v6 = vpop.permute.xlu0 %615 }
 0x63a   :  { %v618_v9 = vpop.permute.xlu1 %617  ;;  %v2655_v10 = vadd.f32 %v616_v6, %v601_v63 }
 0x63b   :  { %v2657_v11 = vadd.f32 %v618_v9, %v602_v4 }
 0x63c   :  { %1945 = vtanh.f32 %v2655_v10 }
 0x63d   :  { %1947 = vtanh.f32 %v2657_v11 }
 0x642   :  { %v1946_v12 = vpop.eup %1945 }
 0x643   :  { %v1948_v13 = vpop.eup %1947  ;;  %627 = vrot.lane.b32.xlu0 %v1946_v12, %s2335_s18 }
 0x644   :  { %629 = vrot.lane.b32.xlu1 %v1948_v13, %s2335_s18 }
 0x673   :  { %v546_v14 = vpop.permute.xlu2 %545 }
 0x674   :  { %v2663_v15 = vmul.f32 %v546_v14, %v530_v28 }
 0x676   :  { %550 = vrot.lane.b32.xlu1 %v2663_v15, %s2336_s4 }
 0x6b5   :  { %v628_v17 = vpop.permute.xlu0 %627 }
 0x6b6   :  { %v630_v19 = vpop.permute.xlu1 %629  ;;  %v633_v20 = vmul.f32 %v628_v17, %v594_v40 }
 0x6b7   :  { %v634_v21 = vmul.f32 %v630_v19, %v595_v43 }
 0x6b8   :  { %v677_v22 = vrot.slane %v633_v20, 2 }
 0x6b9   :  { %v637_v23 = vrot.slane %v634_v21, 7  ;;  %v678_v24 = vrot.slane %v634_v21, 1 }
 0x6bb   :  { %v679_v25 = vsel %vm283_vm2, %v678_v24, %v677_v22  ;;  %v2669_v26 = vsel %vm638_vm5, %v637_v23, %v633_v20  ;;  %v776_v23 = vrot.slane %v2655_v10, 7 }
 0x6bc   :  { %680 = vrot.lane.b32.xlu0 %v679_v25, %s2336_s4 }
 0x6e8   :  { %v551_v27 = vpop.permute.xlu1 %550 }
 0x6e9   :  { %554 = vst.msk [vmem:[#allocation14 + $0x12] sm:$0x3] %vm288_vm3, %v551_v27  ;;  %1860 = vmatmul.msk.f32.vlgmr.msra.gmra.mxu1 %vm198_vm1, %v551_v27 }
 0x6ea   :  { %1107 = vmatpush.msra.mxu1 %v2454_v1 }
 0x6ec   :  { %1108 = vmatpush.msra.mxu1 %v2457_v3 }
 0x6ee   :  { %1109 = vmatpush.msra.mxu1 %v2459_v5 }
 0x6f0   :  { %1110 = vmatpush.msra.mxu1 %v2466_v7 }
 0x72e   :  { %v681_v28 = vpop.permute.xlu0 %680 }
 0x72f   :  { %1861 = vmatmul.msk.f32.vlgmr.msrb.gmra.mxu2 %vm198_vm1, %v681_v28  ;;  %1862 = vmatmul.msk.f32.vlgmr.msrb.gmra.mxu3 %vm198_vm1, %v681_v28 }
 0x730   :  { %1203 = vmatpush.msrb.mxu2 %v2507_v44  ;;  %1230 = vmatpush.msrb.mxu3 %v2531_v49 }
 0x732   :  { %1204 = vmatpush.msrb.mxu2 %v2509_v45  ;;  %1231 = vmatpush.msrb.mxu3 %v2541_v50 }
 0x734   :  { %1205 = vmatpush.msrb.mxu2 %v2513_v46  ;;  %1232 = vmatpush.msrb.mxu3 %v2549_v51 }
 0x736   :  { %1206 = vmatpush.msrb.mxu2 %v2519_v47  ;;  %1233 = vmatpush.msrb.mxu3 %v2557_v52 }
 0x766   :  { %v674_v29 = vpop.f32.mrf.mxu1 }
 0x7b2   :  { %v701_v30 = vpop.f32.mrf.mxu2  ;;  %v756_v31 = vpop.f32.mrf.mxu3 }
 0x7b3   :  { %v702_v32 = vadd.f32 %v701_v30, %v674_v29  ;;  %v760_v34 = vrot.slane %v756_v31, 5  ;;  %v761_v35 = vrot.slane %v756_v31, 6 }
 0x7b5   :  { %v704_v36 = vadd.f32 %v2583_v2, %v702_v32  ;;  %v764_v39 = vadd.f32 %v760_v34, %v2488_v18  ;;  %v765_v40 = vadd.f32 %v761_v35, %v2485_v16  ;;  %v648_v32 = vrot.slane %v2657_v11, 7 }
 0x7b7   :  { %1949 = vtanh.f32 %v704_v36  ;;  %v766_v54 = vmul.f32 0.5, %v764_v39  ;;  %v705_v63 = vmul.f32 0.5, %v704_v36  ;;  %v767_v4 = vmul.f32 0.5, %v765_v40 }
 0x7b8   :  { %1951 = vtanh.f32 %v764_v39 }
 0x7b9   :  { %1953 = vtanh.f32 %v765_v40 }
 0x7ba   :  { %1955 = vtanh.f32 %v766_v54 }
 0x7bb   :  { %1957 = vtanh.f32 %v705_v63  ;;  %v1661_v63 = vrot.slane %v2617_v8, 1 }
 0x7bc   :  { %1959 = vtanh.f32 %v767_v4 }
 0x7bd   :  { %v1950_v43 = vpop.eup %1949 }
 0x7be   :  { %v1952_v48 = vpop.eup %1951  ;;  %712 = vrot.lane.b32.xlu1 %v1950_v43, %s2335_s18  ;;  %v1663_v43 = vrot.slane %v2663_v15, 1 }
 0x7bf   :  { %783 = vrot.lane.b32.xlu2 %v1952_v48, %s2335_s18  ;;  %v1954_v53 = vpop.eup %1953  ;;  %v1669_v48 = vperm.slane %v2663_v15, 0 }
 0x7c0   :  { %785 = vrot.lane.b32.xlu0 %v1954_v53, %s2335_s18  ;;  %v1956_v55 = vpop.eup %1955 }
 0x7c1   :  { %v770_v57 = vadd.f32 1.0, %v1956_v55  ;;  %v1958_v6 = vpop.eup %1957  ;;  %v1698_v4 = vsel %vm1697_vm6, %v2617_v8, %v1669_v48 }
 0x7c2   :  { %v707_v9 = vadd.f32 1.0, %v1958_v6  ;;  %v1960_v12 = vpop.eup %1959 }
 0x7c3   :  { %v772_v58 = vmul.f32 0.5, %v770_v57  ;;  %v771_v14 = vadd.f32 1.0, %v1960_v12  ;;  %v1670_v57 = vperm.slane %v1663_v43, 0 }
 0x7c4   :  { %v708_v13 = vmul.f32 0.5, %v707_v9 }
 0x7c5   :  { %v773_v20 = vmul.f32 0.5, %v771_v14  ;;  %v779_v24 = vmul.f32 %v776_v23, %v772_v58  ;;  %v1699_v15 = vsel %vm1697_vm6, %v1661_v63, %v1670_v57  ;;  %vm1178_vm6 = vcmask 260101  }
 0x7c6   :  { %v710_v29 = vmul.f32 %v708_v13, %v2647_v59 }
 0x7c7   :  { %v780_v34 = vmul.f32 %v773_v20, %v648_v32 }
 0x819   :  { %v784_v60 = vpop.permute.xlu2 %783 }
 0x81a   :  { %v789_v61 = vmul.f32 %v784_v60, %v772_v58 }
 0x81c   :  { %793 = vrot.lane.b32.xlu2 %v789_v61, %s2335_s18 }
 0x830   :  { %v713_v17 = vpop.permute.xlu1 %712 }
 0x831   :  { %v715_v19 = vmul.f32 %v713_v17, %v708_v13 }
 0x832   :  { %v786_v21 = vpop.permute.xlu0 %785 }
 0x833   :  { %717 = vrot.lane.b32.xlu1 %v715_v19, %s2335_s18  ;;  %v790_v22 = vmul.f32 %v786_v21, %v773_v20 }
 0x835   :  { %795 = vrot.lane.b32.xlu0 %v790_v22, %s2335_s18 }
 0x876   :  { %v794_v25 = vpop.permute.xlu2 %793 }
 0x877   :  { %v2698_v27 = vadd.f32 %v794_v25, %v779_v24 }
 0x879   :  { %1961 = vtanh.f32 %v2698_v27 }
 0x87f   :  { %v1962_v28 = vpop.eup %1961 }
 0x880   :  { %805 = vrot.lane.b32.xlu2 %v1962_v28, %s2335_s18 }
 0x8a5   :  { %v718_v30 = vpop.permute.xlu1 %717 }
 0x8a6   :  { %v2703_v31 = vadd.f32 %v718_v30, %v710_v29 }
 0x8a7   :  { %v796_v35 = vpop.permute.xlu0 %795 }
 0x8a8   :  { %1963 = vtanh.f32 %v2703_v31  ;;  %v2709_v36 = vadd.f32 %v796_v35, %v780_v34 }
 0x8aa   :  { %1965 = vtanh.f32 %v2709_v36 }
 0x8ae   :  { %v1964_v39 = vpop.eup %1963 }
 0x8af   :  { %723 = vrot.lane.b32.xlu1 %v1964_v39, %s2335_s18 }
 0x8b0   :  { %v1966_v40 = vpop.eup %1965 }
 0x8b1   :  { %807 = vrot.lane.b32.xlu0 %v1966_v40, %s2335_s18 }
 0x8da   :  { %v806_v54 = vpop.permute.xlu2 %805 }
 0x8db   :  { %v2719_v6 = vmul.f32 %v806_v54, %v772_v58 }
 0x8dd   :  { %v855_v19 = vrot.slane %v2719_v6, 3 }
 0x921   :  { %v724_v53 = vpop.permute.xlu1 %723 }
 0x922   :  { %v726_v55 = vmul.f32 %v724_v53, %v708_v13 }
 0x923   :  { %v808_v9 = vpop.permute.xlu0 %807 }
 0x924   :  { %v1664_v60 = vrot.slane %v726_v55, 1  ;;  %v1673_v61 = vperm.slane %v726_v55, 0  ;;  %728 = vrot.lane.b32.xlu0 %v726_v55, %s2336_s4  ;;  %v2723_v17 = vmul.f32 %v808_v9, %v773_v20 }
 0x926   :  { %v1674_v12 = vperm.slane %v1664_v60, 0  ;;  %v2721_v14 = vsel %vm1700_vm7, %v1698_v4, %v1673_v61  ;;  %v856_v21 = vrot.slane %v2723_v17, 2 }
 0x928   :  { %v2725_v13 = vsel %vm1700_vm7, %v1699_v15, %v1674_v12  ;;  %v857_v22 = vsel %vm283_vm2, %v856_v21, %v855_v19  ;;  %vm1535_vm7 = vcmask 261127  }
 0x929   :  { %858 = vrot.lane.b32.xlu2 %v857_v22, %s2336_s4 }
 0x983   :  { %v859_v8 = vpop.permute.xlu2 %858 }
 0x984   :  { %1864 = vmatmul.msk.f32.vlgmr.msrb.gmra.mxu1 %vm198_vm1, %v859_v8  ;;  %1865 = vmatmul.msk.f32.vlgmr.msra.gmra.mxu2 %vm198_vm1, %v859_v8  ;;  %v826_v8 = vrot.slane %v2709_v36, 7 }
 0x985   :  { %1408 = vmatpush.msra.mxu2 %v2531_v49  ;;  %1381 = vmatpush.msrb.mxu1 %v2507_v44 }
 0x986   :  { %v827_v37 = vsel %vm816_vm14, %v826_v8, %v2698_v27 }
 0x987   :  { %1409 = vmatpush.msra.mxu2 %v2541_v50  ;;  %1382 = vmatpush.msrb.mxu1 %v2509_v45 }
 0x989   :  { %1410 = vmatpush.msra.mxu2 %v2549_v51  ;;  %1383 = vmatpush.msrb.mxu1 %v2513_v46 }
 0x98b   :  { %1411 = vmatpush.msra.mxu2 %v2557_v52  ;;  %1384 = vmatpush.msrb.mxu1 %v2519_v47 }
 0x996   :  { %v729_v58 = vpop.permute.xlu0 %728 }
 0x997   :  { %732 = vst.msk [vmem:[#allocation14 + $0x14] sm:$0x3] %vm288_vm3, %v729_v58  ;;  %1863 = vmatmul.msk.f32.vlgmr.msra.gmra.mxu0 %vm198_vm1, %v729_v58 }
 0x998   :  { %1285 = vmatpush.msra.mxu0 %v2454_v1 }
 0x99a   :  { %1286 = vmatpush.msra.mxu0 %v2457_v3 }
 0x99c   :  { %1287 = vmatpush.msra.mxu0 %v2459_v5 }
 0x99e   :  { %1288 = vmatpush.msra.mxu0 %v2466_v7 }
 0xa01   :  { %v879_v29 = vpop.f32.mrf.mxu1 }
 0xa07   :  { %v934_v20 = vpop.f32.mrf.mxu2 }
 0xa08   :  { %v938_v23 = vrot.slane %v934_v20, 4  ;;  %v939_v24 = vrot.slane %v934_v20, 5 }
 0xa0a   :  { %v942_v25 = vadd.f32 %v938_v23, %v2488_v18  ;;  %v943_v28 = vadd.f32 %v939_v24, %v2485_v16 }
 0xa0c   :  { %1967 = vtanh.f32 %v942_v25  ;;  %v945_v39 = vmul.f32 0.5, %v943_v28  ;;  %v944_v55 = vmul.f32 0.5, %v942_v25  ;;  %v954_v25 = vrot.slane %v2698_v27, 7 }
 0xa0d   :  { %1969 = vtanh.f32 %v943_v28 }
 0xa12   :  { %v1968_v34 = vpop.eup %1967 }
 0xa13   :  { %v1970_v1 = vpop.eup %1969  ;;  %961 = vrot.lane.b32.xlu1 %v1968_v34, %s2335_s18 }
 0xa14   :  { %v852_v30 = vpop.f32.mrf.mxu0  ;;  %963 = vrot.lane.b32.xlu2 %v1970_v1, %s2335_s18 }
 0xa15   :  { %v880_v35 = vadd.f32 %v879_v29, %v852_v30 }
 0xa17   :  { %v882_v3 = vadd.f32 %v2583_v2, %v880_v35 }
 0xa19   :  { %1971 = vtanh.f32 %v882_v3  ;;  %v883_v60 = vmul.f32 0.5, %v882_v3 }
 0xa1a   :  { %1973 = vtanh.f32 %v945_v39 }
 0xa1b   :  { %1975 = vtanh.f32 %v944_v55 }
 0xa1c   :  { %1977 = vtanh.f32 %v883_v60 }
 0xa1f   :  { %v1972_v5 = vpop.eup %1971 }
 0xa20   :  { %890 = vrot.lane.b32.xlu0 %v1972_v5, %s2335_s18  ;;  %v1974_v40 = vpop.eup %1973 }
 0xa21   :  { %v949_v43 = vadd.f32 1.0, %v1974_v40  ;;  %v1976_v57 = vpop.eup %1975 }
 0xa22   :  { %v948_v61 = vadd.f32 1.0, %v1976_v57  ;;  %v1978_v12 = vpop.eup %1977 }
 0xa23   :  { %v951_v48 = vmul.f32 0.5, %v949_v43  ;;  %v885_v15 = vadd.f32 1.0, %v1978_v12 }
 0xa24   :  { %v950_v63 = vmul.f32 0.5, %v948_v61 }
 0xa25   :  { %v886_v19 = vmul.f32 0.5, %v885_v15  ;;  %v958_v58 = vmul.f32 %v951_v48, %v826_v8 }
 0xa26   :  { %v957_v28 = vmul.f32 %v954_v25, %v950_v63 }
 0xa27   :  { %v888_v35 = vmul.f32 %v886_v19, %v2703_v31 }
 0xa6e   :  { %v964_v53 = vpop.permute.xlu2 %963 }
 0xa6f   :  { %v968_v54 = vmul.f32 %v964_v53, %v951_v48 }
 0xa71   :  { %973 = vrot.lane.b32.xlu2 %v968_v54, %s2335_s18 }
 0xa85   :  { %v962_v4 = vpop.permute.xlu1 %961 }
 0xa86   :  { %v967_v9 = vmul.f32 %v962_v4, %v950_v63 }
 0xa88   :  { %971 = vrot.lane.b32.xlu1 %v967_v9, %s2335_s18 }
 0xa92   :  { %v891_v21 = vpop.permute.xlu0 %890 }
 0xa93   :  { %v893_v22 = vmul.f32 %v891_v21, %v886_v19 }
 0xa95   :  { %895 = vrot.lane.b32.xlu0 %v893_v22, %s2335_s18 }
 0xacb   :  { %v974_v20 = vpop.permute.xlu2 %973 }
 0xacc   :  { %v2759_v23 = vadd.f32 %v974_v20, %v958_v58  ;;  %v2045_v58 = vld [vmem:[#allocation7 + $0x18] sm:$0xff]  ;;  %v2047_v20 = vld [vmem:[#allocation7 + $0x8] sm:$0xff] }
 0xace   :  { %1979 = vtanh.f32 %v2759_v23 }
 0xad4   :  { %v1980_v24 = vpop.eup %1979 }
 0xad5   :  { %985 = vrot.lane.b32.xlu2 %v1980_v24, %s2335_s18 }
 0xafa   :  { %v972_v29 = vpop.permute.xlu1 %971 }
 0xafb   :  { %v2764_v30 = vadd.f32 %v972_v29, %v957_v28 }
 0xafd   :  { %1981 = vtanh.f32 %v2764_v30 }
 0xb03   :  { %v1982_v34 = vpop.eup %1981 }
 0xb04   :  { %983 = vrot.lane.b32.xlu1 %v1982_v34, %s2335_s18 }
 0xb07   :  { %v896_v1 = vpop.permute.xlu0 %895 }
 0xb08   :  { %v2769_v3 = vadd.f32 %v896_v1, %v888_v35 }
 0xb0a   :  { %1983 = vtanh.f32 %v2769_v3 }
 0xb10   :  { %v1984_v5 = vpop.eup %1983 }
 0xb11   :  { %901 = vrot.lane.b32.xlu0 %v1984_v5, %s2335_s18 }
 0xb2f   :  { %v986_v39 = vpop.permute.xlu2 %985 }
 0xb30   :  { %v990_v40 = vmul.f32 %v986_v39, %v951_v48 }
 0xb32   :  { %v993_v53 = vrot.slane %v990_v40, 7  ;;  %v1034_v55 = vrot.slane %v990_v40, 3 }
 0xb76   :  { %v984_v43 = vpop.permute.xlu1 %983 }
 0xb77   :  { %v989_v54 = vmul.f32 %v984_v43, %v950_v63 }
 0xb79   :  { %v1033_v57 = vrot.slane %v989_v54, 4  ;;  %v2774_v60 = vsel %vm994_vm8, %v993_v53, %v989_v54 }
 0xb7b   :  { %v1035_v61 = vsel %vm283_vm2, %v1034_v55, %v1033_v57 }
 0xb7c   :  { %1036 = vrot.lane.b32.xlu1 %v1035_v61, %s2336_s4 }
 0xb83   :  { %v902_v4 = vpop.permute.xlu0 %901 }
 0xb84   :  { %v904_v9 = vmul.f32 %v902_v4, %v886_v19  ;;  %v2046_v19 = vld [vmem:[#allocation7 + $0x10] sm:$0xff] }
 0xb86   :  { %v1665_v12 = vrot.slane %v904_v9, 1  ;;  %v1677_v15 = vperm.slane %v904_v9, 0  ;;  %906 = vrot.lane.b32.xlu2 %v904_v9, %s2336_s4 }
 0xb88   :  { %v1678_v48 = vperm.slane %v1665_v12, 0  ;;  %v2780_v63 = vsel %vm1703_vm9, %v2721_v14, %v1677_v15 }
 0xb8a   :  { %v2783_v21 = vsel %vm1703_vm9, %v2725_v13, %v1678_v48  ;;  %vm1537_vm9 = vcmask 253952  }
 0xbe0   :  { %v907_v22 = vpop.permute.xlu2 %906 }
 0xbe1   :  { %910 = vst.msk [vmem:[#allocation14 + $0x16] sm:$0x3] %vm288_vm3, %v907_v22  ;;  %1866 = vmatmul.msk.f32.vlgmr.msra.gmra.mxu3 %vm198_vm1, %v907_v22 }
 0xbe2   :  { %1463 = vmatpush.msra.mxu3 %v2045_v58 }
 0xbe4   :  { %1464 = vmatpush.msra.mxu3 %v2046_v19 }
 0xbe6   :  { %1465 = vmatpush.msra.mxu3 %v2047_v20  ;;  %v1132_v20 = vrot.slane %v2764_v30, 7 }
 0xbe8   :  { %1466 = vmatpush.msra.mxu3 %v2466_v7 }
 0xbee   :  { %v1037_v24 = vpop.permute.xlu1 %1036 }
 0xbef   :  { %1867 = vmatmul.msk.f32.vlgmr.msrb.gmra.mxu0 %vm198_vm1, %v1037_v24  ;;  %1868 = vmatmul.msk.f32.vlgmr.msra.gmra.mxu1 %vm198_vm1, %v1037_v24 }
 0xbf0   :  { %1592 = vmatpush.msra.mxu1 %v2531_v49  ;;  %1565 = vmatpush.msrb.mxu0 %v2507_v44 }
 0xbf2   :  { %1593 = vmatpush.msra.mxu1 %v2541_v50  ;;  %1566 = vmatpush.msrb.mxu0 %v2509_v45 }
 0xbf4   :  { %1594 = vmatpush.msra.mxu1 %v2549_v51  ;;  %1567 = vmatpush.msrb.mxu0 %v2513_v46 }
 0xbf6   :  { %1595 = vmatpush.msra.mxu1 %v2557_v52  ;;  %1568 = vmatpush.msrb.mxu0 %v2519_v47 }
 0xc64   :  { %v1030_v7 = vpop.f32.mrf.mxu3 }
 0xc6c   :  { %v1057_v14 = vpop.f32.mrf.mxu0  ;;  %v1112_v13 = vpop.f32.mrf.mxu1 }
 0xc6d   :  { %v1058_v25 = vadd.f32 %v1057_v14, %v1030_v7  ;;  %v1116_v28 = vrot.slane %v1112_v13, 3  ;;  %v1117_v49 = vrot.slane %v1112_v13, 4  ;;  %v1004_v14 = vrot.slane %v2759_v23, 7 }
 0xc6f   :  { %v1060_v44 = vadd.f32 %v2583_v2, %v1058_v25  ;;  %v1120_v50 = vadd.f32 %v1116_v28, %v2488_v18  ;;  %v1121_v45 = vadd.f32 %v1117_v49, %v2485_v16 }
 0xc71   :  { %1985 = vtanh.f32 %v1060_v44  ;;  %v1061_v52 = vmul.f32 0.5, %v1060_v44  ;;  %v1122_v39 = vmul.f32 0.5, %v1120_v50  ;;  %v1123_v40 = vmul.f32 0.5, %v1121_v45 }
 0xc72   :  { %1987 = vtanh.f32 %v1120_v50 }
 0xc73   :  { %1989 = vtanh.f32 %v1121_v45 }
 0xc74   :  { %1991 = vtanh.f32 %v1061_v52 }
 0xc75   :  { %1993 = vtanh.f32 %v1122_v39 }
 0xc76   :  { %1995 = vtanh.f32 %v1123_v40 }
 0xc77   :  { %v1986_v46 = vpop.eup %1985 }
 0xc78   :  { %v1988_v51 = vpop.eup %1987  ;;  %1068 = vrot.lane.b32.xlu2 %v1986_v46, %s2335_s18 }
 0xc79   :  { %1139 = vrot.lane.b32.xlu0 %v1988_v51, %s2335_s18  ;;  %v1990_v47 = vpop.eup %1989 }
 0xc7a   :  { %1141 = vrot.lane.b32.xlu1 %v1990_v47, %s2335_s18  ;;  %v1992_v29 = vpop.eup %1991 }
 0xc7b   :  { %v1063_v34 = vadd.f32 1.0, %v1992_v29  ;;  %v1994_v43 = vpop.eup %1993 }
 0xc7c   :  { %v1126_v53 = vadd.f32 1.0, %v1994_v43  ;;  %v1996_v54 = vpop.eup %1995 }
 0xc7d   :  { %v1064_v35 = vmul.f32 0.5, %v1063_v34  ;;  %v1127_v55 = vadd.f32 1.0, %v1996_v54 }
 0xc7e   :  { %v1128_v57 = vmul.f32 0.5, %v1126_v53 }
 0xc7f   :  { %v1129_v9 = vmul.f32 0.5, %v1127_v55  ;;  %v1066_v48 = vmul.f32 %v1064_v35, %v2769_v3 }
 0xc80   :  { %v1135_v24 = vmul.f32 %v1132_v20, %v1128_v57 }
 0xc81   :  { %v1136_v25 = vmul.f32 %v1129_v9, %v1004_v14 }
 0xcd2   :  { %v1069_v1 = vpop.permute.xlu2 %1068 }
 0xcd3   :  { %v1071_v5 = vmul.f32 %v1069_v1, %v1064_v35 }
 0xcd5   :  { %1073 = vrot.lane.b32.xlu2 %v1071_v5, %s2335_s18 }
 0xceb   :  { %v1140_v61 = vpop.permute.xlu0 %1139 }
 0xcec   :  { %v1145_v4 = vmul.f32 %v1140_v61, %v1128_v57  ;;  %v1142_v12 = vpop.permute.xlu1 %1141 }
 0xced   :  { %v1146_v15 = vmul.f32 %v1142_v12, %v1129_v9 }
 0xcee   :  { %1149 = vrot.lane.b32.xlu0 %v1145_v4, %s2335_s18 }
 0xcef   :  { %1151 = vrot.lane.b32.xlu1 %v1146_v15, %s2335_s18 }
 0xd2f   :  { %v1074_v22 = vpop.permute.xlu2 %1073 }
 0xd30   :  { %v2808_v58 = vadd.f32 %v1074_v22, %v1066_v48 }
 0xd32   :  { %1997 = vtanh.f32 %v2808_v58 }
 0xd38   :  { %v1998_v19 = vpop.eup %1997 }
 0xd39   :  { %1079 = vrot.lane.b32.xlu2 %v1998_v19, %s2335_s18 }
 0xd60   :  { %v1150_v7 = vpop.permute.xlu0 %1149 }
 0xd61   :  { %v2814_v13 = vadd.f32 %v1150_v7, %v1135_v24  ;;  %v1152_v28 = vpop.permute.xlu1 %1151 }
 0xd62   :  { %v2819_v49 = vadd.f32 %v1152_v28, %v1136_v25 }
 0xd63   :  { %1999 = vtanh.f32 %v2814_v13 }
 0xd64   :  { %2001 = vtanh.f32 %v2819_v49 }
 0xd69   :  { %v2000_v44 = vpop.eup %1999 }
 0xd6a   :  { %1161 = vrot.lane.b32.xlu0 %v2000_v44, %s2335_s18  ;;  %v2002_v50 = vpop.eup %2001 }
 0xd6b   :  { %1163 = vrot.lane.b32.xlu1 %v2002_v50, %s2335_s18 }
 0xd93   :  { %v1080_v45 = vpop.permute.xlu2 %1079 }
 0xd94   :  { %v1082_v46 = vmul.f32 %v1080_v45, %v1064_v35 }
 0xd96   :  { %v1666_v51 = vrot.slane %v1082_v46, 1  ;;  %v1681_v47 = vperm.slane %v1082_v46, 0  ;;  %1084 = vrot.lane.b32.xlu1 %v1082_v46, %s2336_s4 }
 0xd98   :  { %v1682_v52 = vperm.slane %v1666_v51, 0  ;;  %v2826_v29 = vsel %vm1706_vm10, %v2780_v63, %v1681_v47 }
 0xd9a   :  { %v2829_v34 = vsel %vm1706_vm10, %v2783_v21, %v1682_v52 }
 0xddc   :  { %v1162_v1 = vpop.permute.xlu0 %1161 }
 0xddd   :  { %v1167_v5 = vmul.f32 %v1162_v1, %v1128_v57  ;;  %v1164_v39 = vpop.permute.xlu1 %1163 }
 0xdde   :  { %v1168_v40 = vmul.f32 %v1164_v39, %v1129_v9 }
 0xddf   :  { %v1211_v43 = vrot.slane %v1167_v5, 5 }
 0xde0   :  { %v1171_v53 = vrot.slane %v1168_v40, 7  ;;  %v1212_v54 = vrot.slane %v1168_v40, 4 }
 0xde2   :  { %v1213_v35 = vsel %vm283_vm2, %v1212_v54, %v1211_v43  ;;  %v2833_v55 = vsel %vm1172_vm11, %v1171_v53, %v1167_v5 }
 0xde3   :  { %1214 = vrot.lane.b32.xlu0 %v1213_v35, %s2336_s4 }
 0xe08   :  { %v1085_v63 = vpop.permute.xlu1 %1084 }
 0xe09   :  { %1088 = vst.msk [vmem:[#allocation14 + $0x18] sm:$0x3] %vm288_vm3, %v1085_v63  ;;  %1869 = vmatmul.msk.f32.vlgmr.msrb.gmra.mxu2 %vm198_vm1, %v1085_v63  ;;  %v1310_v63 = vrot.slane %v2814_v13, 7 }
 0xe55   :  { %v1215_v21 = vpop.permute.xlu0 %1214 }
 0xe56   :  { %1870 = vmatmul.msk.f32.vlgmr.msrb.gmra.mxu3 %vm198_vm1, %v1215_v21  ;;  %1871 = vmatmul.msk.f32.vlgmr.msra.gmra.mxu0 %vm198_vm1, %v1215_v21 }
 0xe8c   :  { %v1208_v15 = vpop.f32.mrf.mxu2 }
 0xed3   :  { %v1290_v57 = vpop.f32.mrf.mxu0 }
 0xed4   :  { %v1294_v61 = vrot.slane %v1290_v57, 2  ;;  %v1295_v4 = vrot.slane %v1290_v57, 3 }
 0xed6   :  { %v1298_v9 = vadd.f32 %v1294_v61, %v2488_v18  ;;  %v1299_v12 = vadd.f32 %v1295_v4, %v2485_v16 }
 0xed8   :  { %2003 = vtanh.f32 %v1298_v9  ;;  %v1300_v25 = vmul.f32 0.5, %v1298_v9  ;;  %v1182_v9 = vrot.slane %v2819_v49, 7  ;;  %v154_v49 = vld [vmem:[%s3103_s9 + $0x10] sm:$0xff] }
 0xed9   :  { %2005 = vtanh.f32 %v1299_v12  ;;  %v1235_v48 = vpop.f32.mrf.mxu3 }
 0xeda   :  { %v1236_v22 = vadd.f32 %v1235_v48, %v1208_v15 }
 0xedc   :  { %v1238_v19 = vadd.f32 %v2583_v2, %v1236_v22  ;;  %v1301_v2 = vmul.f32 0.5, %v1299_v12 }
 0xede   :  { %v2004_v20 = vpop.eup %2003  ;;  %2007 = vtanh.f32 %v1238_v19  ;;  %v1239_v51 = vmul.f32 0.5, %v1238_v19 }
 0xedf   :  { %v2006_v24 = vpop.eup %2005  ;;  %1317 = vrot.lane.b32.xlu2 %v2004_v20, %s2335_s18  ;;  %2009 = vtanh.f32 %v1300_v25 }
 0xee0   :  { %1319 = vrot.lane.b32.xlu0 %v2006_v24, %s2335_s18  ;;  %2011 = vtanh.f32 %v1301_v2 }
 0xee1   :  { %2013 = vtanh.f32 %v1239_v51 }
 0xee4   :  { %v2008_v7 = vpop.eup %2007 }
 0xee5   :  { %1246 = vrot.lane.b32.xlu1 %v2008_v7, %s2335_s18  ;;  %v2010_v28 = vpop.eup %2009 }
 0xee6   :  { %v1304_v44 = vadd.f32 1.0, %v2010_v28  ;;  %v2012_v47 = vpop.eup %2011 }
 0xee7   :  { %v1305_v52 = vadd.f32 1.0, %v2012_v47  ;;  %v2014_v1 = vpop.eup %2013 }
 0xee8   :  { %v1306_v50 = vmul.f32 0.5, %v1304_v44  ;;  %v1241_v40 = vadd.f32 1.0, %v2014_v1 }
 0xee9   :  { %v1307_v5 = vmul.f32 0.5, %v1305_v52 }
 0xeea   :  { %v1242_v53 = vmul.f32 0.5, %v1241_v40  ;;  %v1313_v21 = vmul.f32 %v1310_v63, %v1306_v50 }
 0xeeb   :  { %v1314_v12 = vmul.f32 %v1307_v5, %v1182_v9 }
 0xeec   :  { %v1244_v22 = vmul.f32 %v1242_v53, %v2808_v58 }
 0xf39   :  { %v1318_v45 = vpop.permute.xlu2 %1317 }
 0xf3a   :  { %v1323_v46 = vmul.f32 %v1318_v45, %v1306_v50 }
 0xf3c   :  { %1327 = vrot.lane.b32.xlu2 %v1323_v46, %s2335_s18 }
 0xf52   :  { %v1320_v39 = vpop.permute.xlu0 %1319 }
 0xf53   :  { %v1324_v43 = vmul.f32 %v1320_v39, %v1307_v5 }
 0xf55   :  { %1329 = vrot.lane.b32.xlu0 %v1324_v43, %s2335_s18 }
 0xf57   :  { %v1247_v54 = vpop.permute.xlu1 %1246 }
 0xf58   :  { %v1249_v35 = vmul.f32 %v1247_v54, %v1242_v53 }
 0xf5a   :  { %1251 = vrot.lane.b32.xlu1 %v1249_v35, %s2335_s18 }
 0xf96   :  { %v1328_v57 = vpop.permute.xlu2 %1327 }
 0xf97   :  { %v2850_v61 = vadd.f32 %v1328_v57, %v1313_v21 }
 0xf99   :  { %2015 = vtanh.f32 %v2850_v61 }
 0xf9f   :  { %v2016_v4 = vpop.eup %2015 }
 0xfa0   :  { %1339 = vrot.lane.b32.xlu2 %v2016_v4, %s2335_s18 }
 0xfc7   :  { %v1330_v15 = vpop.permute.xlu0 %1329 }
 0xfc8   :  { %v2857_v48 = vadd.f32 %v1330_v15, %v1314_v12 }
 0xfca   :  { %2017 = vtanh.f32 %v2857_v48 }
 0xfcc   :  { %v1252_v19 = vpop.permute.xlu1 %1251 }
 0xfcd   :  { %v2861_v20 = vadd.f32 %v1252_v19, %v1244_v22  ;;  %v2889_v22 = vld [vmem:[#allocation11] ss:$0 sm:$0xff] }
 0xfcf   :  { %2019 = vtanh.f32 %v2861_v20 }
 0xfd0   :  { %v2018_v24 = vpop.eup %2017 }
 0xfd1   :  { %1341 = vrot.lane.b32.xlu0 %v2018_v24, %s2335_s18 }
 0xfd5   :  { %v2020_v7 = vpop.eup %2019 }
 0xfd6   :  { %1257 = vrot.lane.b32.xlu1 %v2020_v7, %s2335_s18 }
 0xffa   :  { %v1340_v25 = vpop.permute.xlu2 %1339 }
 0xffb   :  { %v2866_v28 = vmul.f32 %v1340_v25, %v1306_v50 }
 0xffd   :  { %v1389_v46 = vrot.slane %v2866_v28, 6 }
0x1043   :  { %v1342_v44 = vpop.permute.xlu0 %1341 }
0x1044   :  { %v2868_v45 = vmul.f32 %v1342_v44, %v1307_v5 }
0x1046   :  { %v1390_v2 = vrot.slane %v2868_v45, 5 }
0x1048   :  { %v1258_v51 = vpop.permute.xlu1 %1257  ;;  %v1391_v47 = vsel %vm283_vm2, %v1390_v2, %v1389_v46 }
0x1049   :  { %v1260_v52 = vmul.f32 %v1258_v51, %v1242_v53  ;;  %1392 = vrot.lane.b32.xlu2 %v1391_v47, %s2336_s4 }
0x104b   :  { %v1667_v1 = vrot.slane %v1260_v52, 1  ;;  %v1685_v39 = vperm.slane %v1260_v52, 0  ;;  %1262 = vrot.lane.b32.xlu0 %v1260_v52, %s2336_s4 }
0x104d   :  { %v1686_v50 = vperm.slane %v1667_v1, 0  ;;  %v2876_v40 = vsel %vm1709_vm12, %v2826_v29, %v1685_v39 }
0x104f   :  { %v2879_v5 = vsel %vm1709_vm12, %v2829_v34, %v1686_v50 }
0x10a3   :  { %v1393_v43 = vpop.permute.xlu2 %1392 }
0x10a4   :  { %1873 = vmatmul.msk.f32.vlgmr.msra.gmra.mxu2 %vm198_vm1, %v1393_v43  ;;  %1874 = vmatmul.msk.f32.vlgmr.msra.gmra.mxu3 %vm198_vm1, %v1393_v43 }
0x10bd   :  { %v1263_v53 = vpop.permute.xlu0 %1262 }
0x10be   :  { %1266 = vst.msk [vmem:[#allocation14 + $0x1a] sm:$0x3] %vm288_vm3, %v1263_v53  ;;  %1872 = vmatmul.msk.f32.vlgmr.msrb.gmra.mxu1 %vm198_vm1, %v1263_v53 }
0x1127   :  { %v1468_v54 = vpop.f32.mrf.mxu3  ;;  %v1413_v4 = vpop.f32.mrf.mxu2 }
0x1128   :  { %v1472_v35 = vrot.slane %v1468_v54, 1  ;;  %v1473_v63 = vrot.slane %v1468_v54, 2 }
0x112a   :  { %v1476_v21 = vadd.f32 %v1472_v35, %v2488_v18  ;;  %v1477_v29 = vadd.f32 %v1473_v63, %v2485_v16 }
0x112c   :  { %2021 = vtanh.f32 %v1476_v21  ;;  %v1479_v16 = vmul.f32 0.5, %v1477_v29  ;;  %v1478_v2 = vmul.f32 0.5, %v1476_v21 }
0x112d   :  { %2023 = vtanh.f32 %v1477_v29  ;;  %v1360_v29 = vrot.slane %v2857_v48, 7 }
0x1132   :  { %v2022_v34 = vpop.eup %2021 }
0x1133   :  { %v2024_v57 = vpop.eup %2023  ;;  %1495 = vrot.lane.b32.xlu1 %v2022_v34, %s2335_s18 }
0x1134   :  { %1497 = vrot.lane.b32.xlu2 %v2024_v57, %s2335_s18 }
0x113b   :  { %v1386_v12 = vpop.f32.mrf.mxu1 }
0x113c   :  { %v1414_v15 = vadd.f32 %v1413_v4, %v1386_v12  ;;  %v1488_v12 = vrot.slane %v2850_v61, 7 }
0x113e   :  { %v1416_v19 = vadd.f32 %v2889_v22, %v1414_v15 }
0x1140   :  { %2025 = vtanh.f32 %v1416_v19  ;;  %v1417_v50 = vmul.f32 0.5, %v1416_v19 }
0x1141   :  { %2027 = vtanh.f32 %v1479_v16 }
0x1142   :  { %2029 = vtanh.f32 %v1478_v2 }
0x1143   :  { %2031 = vtanh.f32 %v1417_v50 }
0x1146   :  { %v2026_v24 = vpop.eup %2025 }
0x1147   :  { %1424 = vrot.lane.b32.xlu0 %v2026_v24, %s2335_s18  ;;  %v2028_v18 = vpop.eup %2027 }
0x1148   :  { %v1483_v7 = vadd.f32 1.0, %v2028_v18  ;;  %v2030_v51 = vpop.eup %2029 }
0x1149   :  { %v1482_v47 = vadd.f32 1.0, %v2030_v51  ;;  %v2032_v43 = vpop.eup %2031 }
0x114a   :  { %v1485_v25 = vmul.f32 0.5, %v1483_v7  ;;  %v1419_v53 = vadd.f32 1.0, %v2032_v43 }
0x114b   :  { %v1484_v52 = vmul.f32 0.5, %v1482_v47 }
0x114c   :  { %v1420_v54 = vmul.f32 0.5, %v1419_v53  ;;  %v1492_v21 = vmul.f32 %v1485_v25, %v1360_v29 }
0x114d   :  { %v1491_v15 = vmul.f32 %v1488_v12, %v1484_v52 }
0x114e   :  { %v1422_v18 = vmul.f32 %v1420_v54, %v2861_v20 }
0x118e   :  { %v1498_v44 = vpop.permute.xlu2 %1497 }
0x118f   :  { %v1502_v46 = vmul.f32 %v1498_v44, %v1485_v25 }
0x1191   :  { %1507 = vrot.lane.b32.xlu2 %v1502_v46, %s2335_s18 }
0x11a5   :  { %v1496_v1 = vpop.permute.xlu1 %1495 }
0x11a6   :  { %v1501_v39 = vmul.f32 %v1496_v1, %v1484_v52 }
0x11a8   :  { %1505 = vrot.lane.b32.xlu1 %v1501_v39, %s2335_s18 }
0x11b9   :  { %v1425_v35 = vpop.permute.xlu0 %1424 }
0x11ba   :  { %v1427_v63 = vmul.f32 %v1425_v35, %v1420_v54 }
0x11bc   :  { %1429 = vrot.lane.b32.xlu0 %v1427_v63, %s2335_s18 }
0x11eb   :  { %v1508_v34 = vpop.permute.xlu2 %1507 }
0x11ec   :  { %v2899_v57 = vadd.f32 %v1508_v34, %v1492_v21 }
0x11ee   :  { %2033 = vtanh.f32 %v2899_v57 }
0x11f4   :  { %v2034_v4 = vpop.eup %2033 }
0x11f5   :  { %1519 = vrot.lane.b32.xlu2 %v2034_v4, %s2335_s18 }
0x121a   :  { %v1506_v19 = vpop.permute.xlu1 %1505 }
0x121b   :  { %v2904_v24 = vadd.f32 %v1506_v19, %v1491_v15 }
0x121d   :  { %2035 = vtanh.f32 %v2904_v24 }
0x1223   :  { %v2036_v16 = vpop.eup %2035 }
0x1224   :  { %1517 = vrot.lane.b32.xlu1 %v2036_v16, %s2335_s18 }
0x122e   :  { %v1430_v7 = vpop.permute.xlu0 %1429 }
0x122f   :  { %v2909_v44 = vadd.f32 %v1430_v7, %v1422_v18 }
0x1231   :  { %2037 = vtanh.f32 %v2909_v44 }
0x1237   :  { %v2038_v46 = vpop.eup %2037 }
0x1238   :  { %1435 = vrot.lane.b32.xlu0 %v2038_v46, %s2335_s18 }
0x124f   :  { %v1520_v2 = vpop.permute.xlu2 %1519 }
0x1250   :  { %v2913_v51 = vmul.f32 %v1520_v2, %v1485_v25 }
0x1252   :  { %v1574_v39 = vrot.slane %v2913_v51, 6 }
0x1296   :  { %v1518_v47 = vpop.permute.xlu1 %1517 }
0x1297   :  { %v1523_v1 = vmul.f32 %v1518_v47, %v1484_v52 }
0x1299   :  { %v1573_v50 = vrot.slane %v1523_v1, 7 }
0x129b   :  { %v1575_v43 = vsel %vm283_vm2, %v1574_v39, %v1573_v50 }
0x129c   :  { %1576 = vrot.lane.b32.xlu2 %v1575_v43, %s2336_s4 }
0x12aa   :  { %v1436_v53 = vpop.permute.xlu0 %1435 }
0x12ab   :  { %v1438_v35 = vmul.f32 %v1436_v53, %v1420_v54  ;;  %v293_v53 = vsel %vm283_vm2, %v292_v33, %v2502_v42  ;;  %v1005_v42 = vsel %vm994_vm8, %v1004_v14, %v2764_v30  ;;  %v1183_v33 = vsel %vm1172_vm11, %v1182_v9, %v2814_v13  ;;  %v155_v13 = vld [vmem:[%s3103_s9 + $0x18] sm:$0xff]  ;;  %v152_v9 = vld [vmem:[%s3103_s9] sm:$0xff] }
0x12ac   :  { %vm644_vm2 = vcmask 257026   ;;  %vm1350_vm8 = vcmask 1047559   ;;  %v1541_v14 = vrot.slane %v2899_v57, 7  ;;  %1743 = vmatpush.msrb.mxu2 %v155_v13 }
0x12ad   :  { %v1668_v63 = vrot.slane %v1438_v35, 1  ;;  %v1689_v21 = vperm.slane %v1438_v35, 0  ;;  %1440 = vrot.lane.b32.xlu1 %v1438_v35, %s2336_s4  ;;  %v472_v35 = vsel %vm461_vm4, %v471_v62, %v2603_v41  ;;  %vm822_vm4 = vcmask 258051  }
0x12ae   :  { %1744 = vmatpush.msrb.mxu2 %v154_v49 }
0x12af   :  { %v1690_v34 = vperm.slane %v1668_v63, 0  ;;  %v1713_v25 = vsel %vm1712_vm13, %v2876_v40, %v1689_v21  ;;  %v649_v63 = vsel %vm638_vm5, %v648_v32, %v2655_v10  ;;  %vm1000_vm5 = vcmask 259076  }
0x12b1   :  { %v1714_v4 = vsel %vm1712_vm13, %v2879_v5, %v1690_v34 }
0x12f6   :  { %v1577_v52 = vpop.permute.xlu2 %1576 }
0x12f7   :  { %1876 = vmatmul.msk.f32.vlgmr.msra.gmra.mxu1 %vm198_vm1, %v1577_v52 }
0x131f   :  { %v1441_v12 = vpop.permute.xlu1 %1440 }
0x1320   :  { %1444 = vst.msk [vmem:[#allocation14 + $0x1c] sm:$0x3] %vm288_vm3, %v1441_v12  ;;  %1875 = vmatmul.msk.f32.vlgmr.msrb.gmra.mxu0 %vm198_vm1, %v1441_v12 }
0x1374   :  { %v1597_v15 = vpop.f32.mrf.mxu1 }
0x139d   :  { %v1570_v54 = vpop.f32.mrf.mxu0 }
0x139e   :  { %v1598_v19 = vadd.f32 %v1597_v15, %v1570_v54 }
0x13a0   :  { %v1600_v16 = vadd.f32 %v2889_v22, %v1598_v19 }
0x13a2   :  { %2039 = vtanh.f32 %v1600_v16  ;;  %v1601_v40 = vmul.f32 0.5, %v1600_v16 }
0x13a4   :  { %2041 = vtanh.f32 %v1601_v40 }
0x13a8   :  { %v2040_v18 = vpop.eup %2039 }
0x13a9   :  { %1608 = vrot.lane.b32.xlu0 %v2040_v18, %s2335_s18 }
0x13aa   :  { %v2042_v5 = vpop.eup %2041 }
0x13ab   :  { %v1603_v7 = vadd.f32 1.0, %v2042_v5 }
0x13ad   :  { %v1604_v46 = vmul.f32 0.5, %v1603_v7 }
0x13af   :  { %v1606_v39 = vmul.f32 %v1604_v46, %v2909_v44 }
0x141b   :  { %v1609_v2 = vpop.permute.xlu0 %1608 }
0x141c   :  { %v1611_v47 = vmul.f32 %v1609_v2, %v1604_v46 }
0x141e   :  { %1613 = vrot.lane.b32.xlu1 %v1611_v47, %s2335_s18  ;;  %v1900_v47 = vld [vmem:[%s3104_s10] ss:$0 sm:$0xff] }
0x1490   :  { %v1614_v50 = vpop.permute.xlu1 %1613 }
0x1491   :  { %v2928_v43 = vadd.f32 %v1614_v50, %v1606_v39 }
0x1493   :  { %2043 = vtanh.f32 %v2928_v43  ;;  %v1878_v48 = vrot.slane %v2928_v43, 9 }
0x1499   :  { %v2044_v22 = vpop.eup %2043 }
0x149a   :  { %1619 = vrot.lane.b32.xlu2 %v2044_v22, %s2335_s18 }
0x14a2   :  { %294 = vrot.lane.b32.xlu2 %v293_v53, %s2337_s2 }
0x14aa   :  { %473 = vrot.lane.b32.xlu2 %v472_v35, %s2337_s2 }
0x14b2   :  { %650 = vrot.lane.b32.xlu2 %v649_v63, %s2337_s2 }
0x14ba   :  { %828 = vrot.lane.b32.xlu2 %v827_v37, %s2337_s2 }
0x14c2   :  { %1006 = vrot.lane.b32.xlu2 %v1005_v42, %s2337_s2 }
0x14ca   :  { %1184 = vrot.lane.b32.xlu2 %v1183_v33, %s2337_s2 }
0x14d2   :  { %1528 = vrot.lane.b32.xlu2 %v1523_v1, %s2336_s4 }
0x14f4   :  { %v1620_v38 = vpop.permute.xlu2 %1619 }
0x14f5   :  { %v1622_v41 = vmul.f32 %v1620_v38, %v1604_v46 }
0x14f7   :  { %v1635_v62 = vrot.slane %v1622_v41, 1  ;;  %v1693_v10 = vperm.slane %v1622_v41, 0 }
0x14f9   :  { %1638 = vrot.lane.b32.xlu2 %v1635_v62, %s2336_s4  ;;  %v1694_v11 = vperm.slane %v1635_v62, 0  ;;  %v1716_v27 = vsel %vm1715_vm15, %v1713_v25, %v1693_v10 }
0x14fa   :  { %1723 = vrot.lane.b32.xlu0 %v1716_v27, %s2336_s4 }
0x14fb   :  { %v1717_v32 = vsel %vm1715_vm15, %v1714_v4, %v1694_v11 }
0x14fc   :  { %v295_v36 = vpop.permute.xlu2 %294  ;;  %1725 = vrot.lane.b32.xlu1 %v1717_v32, %s2336_s4 }
0x14fd   :  { %297 = vst.msk [vmem:[#allocation16] sm:$0x3] %vm288_vm3, %v295_v36 }
0x1501   :  { %1446 = vrot.lane.b32.xlu2 %v2909_v44, %s2337_s2 }
0x1502   :  { %380 = vrot.lane.b32.xlu0 %v2607_v56, %s2337_s2  ;;  %v815_v56 = vrot.slane %v2723_v17, 7 }
0x1504   :  { %v474_v8 = vpop.permute.xlu2 %473  ;;  %463 = vrot.lane.b32.xlu1 %v2613_v0, %s2336_s4  ;;  %v817_v0 = vsel %vm816_vm14, %v815_v56, %v2719_v6 }
0x1505   :  { %477 = vst.msk [vmem:[#allocation16 + $0x1] sm:$0x6] %vm467_vm0, %v474_v8 }
0x1509   :  { %1630 = vrot.lane.b32.xlu2 %v2928_v43, %s2337_s2 }
0x150a   :  { %556 = vrot.lane.b32.xlu0 %v2647_v59, %s2337_s2 }
0x150c   :  { %v651_v23 = vpop.permute.xlu2 %650  ;;  %640 = vrot.lane.b32.xlu1 %v2669_v26, %s2336_s4 }
0x150d   :  { %654 = vst.msk [vmem:[#allocation16 + $0x2] sm:$0xc] %vm644_vm2, %v651_v23 }
0x1512   :  { %734 = vrot.lane.b32.xlu0 %v2703_v31, %s2337_s2  ;;  %v1349_v31 = vrot.slane %v2868_v45, 7 }
0x1514   :  { %v829_v30 = vpop.permute.xlu2 %828  ;;  %818 = vrot.lane.b32.xlu1 %v817_v0, %s2336_s4  ;;  %v1351_v6 = vsel %vm1350_vm8, %v1349_v31, %v2866_v28 }
0x1515   :  { %832 = vst.msk [vmem:[#allocation16 + $0x3] sm:$0x18] %vm822_vm4, %v829_v30 }
0x151a   :  { %912 = vrot.lane.b32.xlu0 %v2769_v3, %s2337_s2  ;;  %v1527_v3 = vrot.slane %v2913_v51, 7 }
0x151c   :  { %v1007_v59 = vpop.permute.xlu2 %1006  ;;  %996 = vrot.lane.b32.xlu1 %v2774_v60, %s2336_s4  ;;  %v1877_v60 = vrot.slane %v1622_v41, 9 }
0x151d   :  { %1010 = vst.msk [vmem:[#allocation16 + $0x4] sm:$0x30] %vm1000_vm5, %v1007_v59 }
0x1522   :  { %1090 = vrot.lane.b32.xlu0 %v2808_v58, %s2337_s2  ;;  %v1361_v58 = vsel %vm1350_vm8, %v1360_v29, %v2850_v61  ;;  %v1648_v61 = vrot.slane %v2928_v43, 1 }
0x1524   :  { %v1185_v26 = vpop.permute.xlu2 %1184  ;;  %1174 = vrot.lane.b32.xlu1 %v2833_v55, %s2336_s4  ;;  %v153_v55 = vld [vmem:[%s3103_s9 + $0x8] sm:$0xff]  ;;  %s2338_s9 = smov [#allocation14]  }
0x1525   :  { %1188 = vst.msk [vmem:[#allocation16 + $0x5] sm:$0x60] %vm1178_vm6, %v1185_v26  ;;  %1745 = vmatpush.msrb.mxu2 %v153_v55  ;;  %s1774_s21 = sshll.u32 %s2338_s9, 4  ;;  %s1775_s21 = int_to_ptr.vmem [resolvable:$true] %s1774_s21 }
0x1527   :  { %1746 = vmatpush.msrb.mxu2 %v152_v9 }
0x152a   :  { %1268 = vrot.lane.b32.xlu0 %v2861_v20, %s2337_s2 }
0x152c   :  { %v1529_v17 = vpop.permute.xlu2 %1528  ;;  %1352 = vrot.lane.b32.xlu1 %v1351_v6, %s2336_s4 }
0x152d   :  { %1536 = vst.msk [vmem:[#allocation14 + $0x7] sm:$0x80] %vm1535_vm7, %v1529_v17 }
0x152e   :  { %1644 = vst.msk [vmem:[#allocation17 - $0x7] sm:$0x80] %vm1535_vm7, %v1529_v17 }
0x1532   :  { %1530 = vrot.lane.b32.xlu0 %v1527_v3, %s2336_s4 }
0x1534   :  { %1624 = vrot.lane.b32.xlu1 %v1622_v41, %s2336_s4 }
0x153a   :  { %1640 = vrot.lane.b32.xlu0 %v1877_v60, %s2336_s4  ;;  %s2340_s4 = smov 2  }
0x153c   :  { %1362 = vrot.lane.b32.xlu1 %v1361_v58, %s2337_s2 }
0x1542   :  { %1542 = vrot.lane.b32.xlu0 %v2904_v24, %s2337_s2 }
0x1544   :  { %1544 = vrot.lane.b32.xlu1 %v1541_v14, %s2337_s2 }
0x154a   :  { %1651 = vrot.lane.b32.xlu0 %v1648_v61, %s2337_s2 }
0x154c   :  { %1653 = vrot.lane.b32.xlu1 %v1878_v48, %s2337_s2  ;;  %s1789_s2 = sshll.u32 %s3107_s13, 4  ;;  %s1790_s2 = int_to_ptr.hbm [resolvable:$true] %s1789_s2 }
0x1553   :  { %v1639_v20 = vpop.permute.xlu2 %1638 }
0x1554   :  { %1646 = vst.msk [vmem:[#allocation17 - $0x5] sm:$0x80] %vm1535_vm7, %v1639_v20 }
0x155b   :  { %v1447_v28 = vpop.permute.xlu2 %1446 }
0x155c   :  { %1450 = vst.msk [vmem:[#allocation16 + $0x1c] sm:$0x3] %vm288_vm3, %v1447_v28 }
0x1563   :  { %v1631_v45 = vpop.permute.xlu2 %1630 }
0x1564   :  { %1634 = vst.msk [vmem:[#allocation16 + $0x1e] sm:$0x3] %vm288_vm3, %v1631_v45 }
0x156c   :  { %v1724_v29 = vpop.permute.xlu0 %1723 }
0x156d   :  { %1879 = vmatmul.msk.f32.vlgmr.msrb.gmra.mxu2 %vm198_vm1, %v1724_v29 }
0x156e   :  { %v1726_v57 = vpop.permute.xlu1 %1725 }
0x1574   :  { %v381_v24 = vpop.permute.xlu0 %380 }
0x1575   :  { %384 = vst.msk [vmem:[#allocation16 + $0x10] sm:$0x3] %vm288_vm3, %v381_v24  ;;  %1880 = vmatmul.msk.f32.gmra.mxu2 %vm198_vm1, %v1726_v57  ;;  %vm1356_vm1 = vcmask 261126  }
0x1576   :  { %v464_v44 = vpop.permute.xlu1 %463 }
0x1577   :  { %468 = vst.msk [vmem:[#allocation14 + $0x1] sm:$0x6] %vm467_vm0, %v464_v44 }
0x157c   :  { %v557_v51 = vpop.permute.xlu0 %556 }
0x157d   :  { %560 = vst.msk [vmem:[#allocation16 + $0x12] sm:$0x3] %vm288_vm3, %v557_v51 }
0x157e   :  { %v641_v1 = vpop.permute.xlu1 %640 }
0x157f   :  { %645 = vst.msk [vmem:[#allocation14 + $0x2] sm:$0xc] %vm644_vm2, %v641_v1 }
0x1584   :  { %v735_v21 = vpop.permute.xlu0 %734 }
0x1585   :  { %738 = vst.msk [vmem:[#allocation16 + $0x14] sm:$0x3] %vm288_vm3, %v735_v21 }
0x1586   :  { %v819_v34 = vpop.permute.xlu1 %818 }
0x1587   :  { %823 = vst.msk [vmem:[#allocation14 + $0x3] sm:$0x18] %vm822_vm4, %v819_v34 }
0x158c   :  { %v913_v25 = vpop.permute.xlu0 %912 }
0x158d   :  { %916 = vst.msk [vmem:[#allocation16 + $0x16] sm:$0x3] %vm288_vm3, %v913_v25 }
0x158e   :  { %v997_v4 = vpop.permute.xlu1 %996 }
0x158f   :  { %1001 = vst.msk [vmem:[#allocation14 + $0x4] sm:$0x30] %vm1000_vm5, %v997_v4 }
0x1594   :  { %v1091_v52 = vpop.permute.xlu0 %1090 }
0x1595   :  { %1094 = vst.msk [vmem:[#allocation16 + $0x18] sm:$0x3] %vm288_vm3, %v1091_v52 }
0x1596   :  { %v1175_v12 = vpop.permute.xlu1 %1174 }
0x1597   :  { %1179 = vst.msk [vmem:[#allocation14 + $0x5] sm:$0x60] %vm1178_vm6, %v1175_v12 }
0x159c   :  { %v1269_v15 = vpop.permute.xlu0 %1268 }
0x159d   :  { %1272 = vst.msk [vmem:[#allocation16 + $0x1a] sm:$0x3] %vm288_vm3, %v1269_v15 }
0x159e   :  { %v1353_v54 = vpop.permute.xlu1 %1352 }
0x159f   :  { %1357 = vst.msk [vmem:[#allocation14 + $0x6] sm:$0xc0] %vm1356_vm1, %v1353_v54 }
0x15a4   :  { %v1531_v19 = vpop.permute.xlu0 %1530 }
0x15a5   :  { %1538 = vst.msk [vmem:[#allocation14 + $0xf] sm:$0x1] %vm1537_vm9, %v1531_v19 }
0x15a6   :  { %1645 = vst.msk [vmem:[#allocation17 + $0x1] sm:$0x1] %vm1537_vm9, %v1531_v19  ;;  %v1625_v16 = vpop.permute.xlu1 %1624 }
0x15a7   :  { %1628 = vst.msk [vmem:[#allocation14 + $0x1e] sm:$0x3] %vm288_vm3, %v1625_v16  ;;  %vm1754_vm3 = vcmask 64512  }
0x15a8   :  { %1782 = dma.vmem_to_hbm [thread:$0]  %s1775_s21, 512, %s1777_s22, [#allocation15], %s2335_s18, %s2335_s18, %s2340_s4  }
0x15a9   :  { %s1763_s21 = sshll.u32 %s3105_s11, 4  ;;  %s1764_s21 = int_to_ptr.hbm [resolvable:$true] %s1763_s21 }
0x15ac   :  { %v1641_v18 = vpop.permute.xlu0 %1640 }
0x15ad   :  { %1647 = vst.msk [vmem:[#allocation17 + $0x3] sm:$0x1] %vm1537_vm9, %v1641_v18 }
0x15ae   :  { %v1363_v40 = vpop.permute.xlu1 %1362  ;;  %1808 = dma.vmem_to_hbm [thread:$0]  %s1801_s1, 64, %s1803_s25, [#allocation18], %s2335_s18, %s2335_s18, %s2340_s4  }
0x15af   :  { %1366 = vst.msk [vmem:[#allocation16 + $0x6] sm:$0xc0] %vm1356_vm1, %v1363_v40 }
0x15b4   :  { %v1543_v5 = vpop.permute.xlu0 %1542 }
0x15b5   :  { %1549 = vst.msk [vmem:[#allocation16 + $0x7] sm:$0x80] %vm1535_vm7, %v1543_v5 }
0x15b6   :  { %1657 = vst.msk [vmem:[#allocation19 - $0x7] sm:$0x80] %vm1535_vm7, %v1543_v5  ;;  %v1545_v7 = vpop.permute.xlu1 %1544 }
0x15b7   :  { %1550 = vst.msk [vmem:[#allocation16 + $0xf] sm:$0x1] %vm1537_vm9, %v1545_v7 }
0x15b8   :  { %1658 = vst.msk [vmem:[#allocation19 + $0x1] sm:$0x1] %vm1537_vm9, %v1545_v7  ;;  %1795 = dma.vmem_to_hbm [thread:$0]  %s1788_s28, 512, %s1790_s2, [#allocation15], %s2335_s18, %s2335_s18, %s2340_s4  }
0x15bc   :  { %v1652_v46 = vpop.permute.xlu0 %1651 }
0x15bd   :  { %1659 = vst.msk [vmem:[#allocation19 - $0x5] sm:$0x80] %vm1535_vm7, %v1652_v46 }
0x15be   :  { %v1654_v2 = vpop.permute.xlu1 %1653 }
0x15bf   :  { %1660 = vst.msk [vmem:[#allocation19 + $0x3] sm:$0x1] %vm1537_vm9, %v1654_v2 }
0x15c0   :  { %1821 = dma.vmem_to_hbm [thread:$0]  %s1814_s16, 64, %s1816_s7, [#allocation18], %s2335_s18, %s2335_s18, %s2340_s4  }
0x15f0   :  { %v1748_v39 = vpop.f32.mrf.mxu2 }
0x15f1   :  { %v1749_v50 = vadd.f32 %v1900_v47, %v1748_v39 }
0x15f3   :  { %1755 = vst.msk [vmem:[#allocation13] sm:$0xff] %vm1754_vm3, %v1749_v50 }
0x15f8   :  { %v1751_v43 = vpop.f32.mrf.mxu2 }
0x15f9   :  { %v1752_v22 = vadd.f32 %v1900_v47, %v1751_v43 }
0x15fb   :  { %1756 = vst.msk [vmem:[#allocation13 + $0x8] sm:$0xff] %vm1754_vm3, %v1752_v22 }
0x15fc   :  { %1769 = dma.vmem_to_hbm [thread:$0]  %s1762_s17, 256, %s1764_s21, [#allocation4], %s2328_s26, %s2328_s26, %s2329_s27  }
0x15fd   :  { %2321 = dma.done.wait [#allocation4], 256  }
0x15fe   :  { %2322 = vsyncadd [#allocation4], 4294967040 }
0x15ff   :  { %2323 = dma.done.wait [#allocation15], 1024  }
0x1600   :  { %2324 = vsyncadd [#allocation15], 4294966272 }
0x1601   :  { %2325 = dma.done.wait [#allocation18], 128  }
0x1602   :  { %2326 = vsyncadd [#allocation18], 4294967168 }
0x1603   :  { %1842 = vsyncpa [#allocation3], 1 }
0x1604   :  { %1843 = vsyncpa [#allocation6], 1 }
0x1605   :  { %1844 = vsyncpa [#allocation9], 1 }
0x1606   :  { %1845 = vsyncpa [#allocation12], 1 }
0x1607   :  { %1846 = vsyncpa [#allocation4], 1 }
0x1608   :  { %1847 = vsyncpa [#allocation15], 1 }
0x1609   :  { %1848 = vsyncpa [#allocation18], 1 }

</bundles_post_ra>
